<compile_context>
chip_gen: v7x
topology: tpu7x:2x2x1
jax: 0.10.0
libtpu: 0.0.40
codegen_flags: <defaults>
</compile_context>

<pallas_src>
import functools
import math

import jax
import jax.numpy as jnp
from jax.experimental import pallas as pl
from jax.experimental.pallas import tpu as pltpu


# ----------------------------------------------------------------------------
# Single fused kernel: input proj + pos-enc  ->  L encoder layers  ->  decoder
# ----------------------------------------------------------------------------

def _fused_transformer_kernel(
    src_ref, enc_w_ref, enc_b_ref, pe_ref,
    wqkv_ref, bqkv_ref, wo_ref, bo_ref,
    ln1g_ref, ln1b_ref, w1_ref, b1_ref, w2_ref, b2_ref,
    ln2g_ref, ln2b_ref, dec_w_ref, dec_b_ref,
    out_ref, act_ref,
    *, nhead, eps, nbatch, seqlen, in_scale):
  layer = pl.program_id(0)
  num_layers = pl.num_programs(0)

  N, S = nbatch, seqlen
  NS, D = act_ref.shape
  dh = D // nhead
  attn_scale = 1.0 / math.sqrt(dh)

  # ---- grid step 0: input Linear + *sqrt(d_model) + positional encoding ----
  @pl.when(layer == 0)
  def _():
    ci = src_ref.shape[2]
    x_in = src_ref[...].reshape(NS, ci).astype(jnp.bfloat16)
    y = jnp.dot(x_in, enc_w_ref[...], preferred_element_type=jnp.float32)
    y = (y + enc_b_ref[...]) * in_scale
    y = y.reshape(N, S, D) + pe_ref[...][None]          # broadcast PE over batch
    act_ref[...] = y.reshape(NS, D)

  # ---- encoder layer `layer` (post-norm, ReLU, dropout = identity) ----
  x = act_ref[...]                                       # (NS, D) f32 residual

  # fused QKV projection: one MXU call on the (D, 3D) weight
  qkv = jnp.dot(x.astype(jnp.bfloat16), wqkv_ref[0],
                preferred_element_type=jnp.float32) + bqkv_ref[0]

  # multi-head self-attention: batch over N, static loop over heads
  heads = []
  for h in range(nhead):
    qh = qkv[:, h * dh:(h + 1) * dh].reshape(N, S, dh).astype(jnp.bfloat16)
    kh = qkv[:, D + h * dh:D + (h + 1) * dh].reshape(N, S, dh).astype(jnp.bfloat16)
    vh = qkv[:, 2 * D + h * dh:2 * D + (h + 1) * dh].reshape(N, S, dh).astype(jnp.bfloat16)
    # scores (N, S, S): contract head dim, batch over N, no explicit transpose
    s = jax.lax.dot_general(qh, kh, (((2,), (2,)), ((0,), (0,))),
                            preferred_element_type=jnp.float32) * attn_scale
    m = jnp.max(s, axis=-1, keepdims=True)
    p = jnp.exp(s - m)
    denom = jnp.sum(p, axis=-1, keepdims=True)
    p = p * pl.reciprocal(denom, approx=True)
    o = jax.lax.dot_general(p.astype(jnp.bfloat16), vh,
                            (((2,), (1,)), ((0,), (0,))),
                            preferred_element_type=jnp.float32)
    heads.append(o)                                       # (N, S, dh)
  attn = jnp.concatenate(heads, axis=-1).reshape(NS, D)

  # output projection + residual + LayerNorm1 (f32 math)
  attn = jnp.dot(attn.astype(jnp.bfloat16), wo_ref[0],
                 preferred_element_type=jnp.float32) + bo_ref[0]
  y = x + attn
  mu = jnp.mean(y, axis=-1, keepdims=True)
  var = jnp.mean((y - mu) ** 2, axis=-1, keepdims=True)
  y = (y - mu) * jax.lax.rsqrt(var + eps) * ln1g_ref[0] + ln1b_ref[0]

  # feed-forward (ReLU) + residual + LayerNorm2
  ff = jnp.dot(y.astype(jnp.bfloat16), w1_ref[0],
               preferred_element_type=jnp.float32) + b1_ref[0]
  ff = jnp.maximum(ff, 0.0)
  ff = jnp.dot(ff.astype(jnp.bfloat16), w2_ref[0],
               preferred_element_type=jnp.float32) + b2_ref[0]
  z = y + ff
  mu = jnp.mean(z, axis=-1, keepdims=True)
  var = jnp.mean((z - mu) ** 2, axis=-1, keepdims=True)
  z = (z - mu) * jax.lax.rsqrt(var + eps) * ln2g_ref[0] + ln2b_ref[0]

  act_ref[...] = z

  # ---- last grid step: decoder Linear(D, 1), lane-dense (1, NS) output row ----
  @pl.when(layer == num_layers - 1)
  def _():
    o = jax.lax.dot_general(dec_w_ref[...], z, (((1,), (1,)), ((), ())),
                            preferred_element_type=jnp.float32)
    out_ref[...] = o + dec_b_ref[...]


def fused_transformer(src_nsd, params, *, nhead, eps=1e-5):
  """src_nsd: (N, S, input_dim) -> (1, N*S) decoder output, N-major."""
  N, S, Ci = src_nsd.shape
  p = params["layers"]
  D = p["wo"].shape[1]
  F = p["w1"].shape[2]
  L = p["wqkv"].shape[0]
  d_model = params["d_model"]

  kernel = functools.partial(
      _fused_transformer_kernel, nhead=nhead, eps=eps,
      nbatch=N, seqlen=S, in_scale=math.sqrt(d_model))

  const2 = lambda l: (0, 0)
  const3 = lambda l: (0, 0, 0)
  stack3 = lambda l: (l, 0, 0)

  in_specs = [
      pl.BlockSpec((N, S, Ci), const3),          # src (resident, fetched once)
      pl.BlockSpec((Ci, D), const2),             # enc_w
      pl.BlockSpec((1, D), const2),              # enc_b
      pl.BlockSpec((S, D), const2),              # pe
      pl.BlockSpec((1, D, 3 * D), stack3),       # wqkv   (per-layer)
      pl.BlockSpec((1, 1, 3 * D), stack3),       # bqkv
      pl.BlockSpec((1, D, D), stack3),           # wo
      pl.BlockSpec((1, 1, D), stack3),           # bo
      pl.BlockSpec((1, 1, D), stack3),           # ln1_g
      pl.BlockSpec((1, 1, D), stack3),           # ln1_b
      pl.BlockSpec((1, D, F), stack3),           # w1
      pl.BlockSpec((1, 1, F), stack3),           # b1
      pl.BlockSpec((1, F, D), stack3),           # w2
      pl.BlockSpec((1, 1, D), stack3),           # b2
      pl.BlockSpec((1, 1, D), stack3),           # ln2_g
      pl.BlockSpec((1, 1, D), stack3),           # ln2_b
      pl.BlockSpec((1, D), const2),              # dec_w_row
      pl.BlockSpec((1, 1), const2),              # dec_b
  ]

  return pl.pallas_call(
      kernel,
      out_shape=jax.ShapeDtypeStruct((1, N * S), jnp.float32),
      grid=(L,),
      in_specs=in_specs,
      out_specs=pl.BlockSpec((1, N * S), const2),
      scratch_shapes=[pltpu.VMEM((N * S, D), jnp.float32)],   # residual stream
      compiler_params=pltpu.CompilerParams(
          dimension_semantics=("arbitrary",)),
  )(src_nsd, params["enc_w"], params["enc_b"], params["pe_sd"],
    p["wqkv"], p["bqkv"], p["wo"], p["bo"],
    p["ln1_g"], p["ln1_b"], p["w1"], p["b1"], p["w2"], p["b2"],
    p["ln2_g"], p["ln2_b"],
    params["dec_w_row"], params["dec_b"])


# ----------------------------------------------------------------------------
# Parameter construction (deterministic, PyTorch-like semantics)
# ----------------------------------------------------------------------------

def make_positional_encoding(d_model, max_len=5000):
  position = jnp.arange(max_len, dtype=jnp.float32)[:, None]
  div_term = jnp.exp(jnp.arange(0, d_model, 2, dtype=jnp.float32)
                     * -(math.log(10000.0) / d_model))
  pe = jnp.zeros((max_len, d_model), jnp.float32)
  pe = pe.at[:, 0::2].set(jnp.sin(position * div_term))
  pe = pe.at[:, 1::2].set(jnp.cos(position * div_term))
  return pe                                               # (max_len, d_model)


def _init_linear(key, fan_in, fan_out):
  k1, k2 = jax.random.split(key)
  bound = 1.0 / math.sqrt(fan_in)
  w = jax.random.uniform(k1, (fan_in, fan_out), jnp.float32, -bound, bound)
  b = jax.random.uniform(k2, (fan_out,), jnp.float32, -bound, bound)
  return w, b


def init_params(key, input_dim, d_model, nhead, num_layers, dim_feedforward,
                max_len=64):
  keys = jax.random.split(key, 2 + num_layers)
  enc_w, enc_b = _init_linear(keys[0], input_dim, d_model)
  dec_w, dec_b = _init_linear(keys[1], d_model, 1)

  acc = dict(wqkv=[], bqkv=[], wo=[], bo=[], w1=[], b1=[], w2=[], b2=[])
  for l in range(num_layers):
    lk = jax.random.split(keys[2 + l], 6)
    wq, bq = _init_linear(lk[0], d_model, d_model)
    wk, bk = _init_linear(lk[1], d_model, d_model)
    wv, bv = _init_linear(lk[2], d_model, d_model)
    wo, bo = _init_linear(lk[3], d_model, d_model)
    w1, b1 = _init_linear(lk[4], d_model, dim_feedforward)
    w2, b2 = _init_linear(lk[5], dim_feedforward, d_model)
    acc["wqkv"].append(jnp.concatenate([wq, wk, wv], axis=1))
    acc["bqkv"].append(jnp.concatenate([bq, bk, bv])[None, :])
    acc["wo"].append(wo); acc["bo"].append(bo[None, :])
    acc["w1"].append(w1); acc["b1"].append(b1[None, :])
    acc["w2"].append(w2); acc["b2"].append(b2[None, :])

  L = num_layers
  layers = {
      # MXU matmul weights stored in bf16; biases / LayerNorm params in f32
      "wqkv": jnp.stack(acc["wqkv"]).astype(jnp.bfloat16),
      "bqkv": jnp.stack(acc["bqkv"]),
      "wo": jnp.stack(acc["wo"]).astype(jnp.bfloat16),
      "bo": jnp.stack(acc["bo"]),
      "w1": jnp.stack(acc["w1"]).astype(jnp.bfloat16),
      "b1": jnp.stack(acc["b1"]),
      "w2": jnp.stack(acc["w2"]).astype(jnp.bfloat16),
      "b2": jnp.stack(acc["b2"]),
      "ln1_g": jnp.ones((L, 1, d_model), jnp.float32),
      "ln1_b": jnp.zeros((L, 1, d_model), jnp.float32),
      "ln2_g": jnp.ones((L, 1, d_model), jnp.float32),
      "ln2_b": jnp.zeros((L, 1, d_model), jnp.float32),
  }

  return dict(
      d_model=d_model, nhead=nhead,
      enc_w=enc_w.astype(jnp.bfloat16), enc_b=enc_b[None, :],
      dec_w_row=dec_w.T, dec_b=dec_b.reshape(1, 1),
      pe=make_positional_encoding(d_model, max_len),
      layers=layers,
  )


# ----------------------------------------------------------------------------
# Forward pass: a single pallas_call; only layout glue in the wrapper
# ----------------------------------------------------------------------------

def transformer_forward(params, src):
  S, N, _ = src.shape
  x = jnp.transpose(src, (1, 0, 2))                      # (N, S, input_dim)
  call_params = dict(params)
  call_params["pe_sd"] = params["pe"][:S, :]             # (S, d_model)

  out = fused_transformer(x, call_params, nhead=params["nhead"])  # (1, N*S)
  return out.reshape(N, S).transpose(1, 0)[:, :, None]   # (S, N, 1)


# ----------------------------------------------------------------------------

if __name__ == "__main__":
  SEQ, BATCH, INPUT_DIM = 8, 2, 4
  D_MODEL, NHEAD, NUM_LAYERS, DIM_FF = 32, 4, 2, 64

  key = jax.random.PRNGKey(0)
  pkey, xkey = jax.random.split(key)

  params = init_params(pkey, INPUT_DIM, D_MODEL, NHEAD, NUM_LAYERS, DIM_FF)
  src = jax.random.normal(xkey, (SEQ, BATCH, INPUT_DIM), jnp.float32)

  out = transformer_forward(params, src)
  out = jax.block_until_ready(out)

  assert out.shape == (SEQ, BATCH, 1), out.shape
  assert bool(jnp.all(jnp.isfinite(out))), "non-finite output"
  print("KERNEL_OK")
</pallas_src>

<mosaic_0001>
module attributes {stable_mosaic.version = 11 : i64} {
  func.func @_fused_transformer_kernel(%arg0: i32, %arg1: memref<2x8x4xf32, #tpu.memory_space<vmem>>, %arg2: memref<4x32xbf16, #tpu.memory_space<vmem>>, %arg3: memref<1x32xf32, #tpu.memory_space<vmem>>, %arg4: memref<8x32xf32, #tpu.memory_space<vmem>>, %arg5: memref<1x32x96xbf16, #tpu.memory_space<vmem>>, %arg6: memref<1x1x96xf32, #tpu.memory_space<vmem>>, %arg7: memref<1x32x32xbf16, #tpu.memory_space<vmem>>, %arg8: memref<1x1x32xf32, #tpu.memory_space<vmem>>, %arg9: memref<1x1x32xf32, #tpu.memory_space<vmem>>, %arg10: memref<1x1x32xf32, #tpu.memory_space<vmem>>, %arg11: memref<1x32x64xbf16, #tpu.memory_space<vmem>>, %arg12: memref<1x1x64xf32, #tpu.memory_space<vmem>>, %arg13: memref<1x64x32xbf16, #tpu.memory_space<vmem>>, %arg14: memref<1x1x32xf32, #tpu.memory_space<vmem>>, %arg15: memref<1x1x32xf32, #tpu.memory_space<vmem>>, %arg16: memref<1x1x32xf32, #tpu.memory_space<vmem>>, %arg17: memref<1x32xf32, #tpu.memory_space<vmem>>, %arg18: memref<1x1xf32, #tpu.memory_space<vmem>>, %arg19: memref<1x16xf32, #tpu.memory_space<vmem>>, %arg20: memref<16x32xf32, #tpu.memory_space<vmem>>) attributes {dimension_semantics = [#tpu.dimension_semantics<arbitrary>], iteration_bounds = array<i64: 2>, scalar_prefetch = 0 : i64, scratch_operands = 1 : i64, tpu.core_type = #tpu.core_type<tc>, window_params = [{pipeline_mode = #tpu.pipeline_mode<synchronous>, transform_indices = @transform_0, window_bounds = array<i64: 2, 8, 4>}, {pipeline_mode = #tpu.pipeline_mode<synchronous>, transform_indices = @transform_1, window_bounds = array<i64: 4, 32>}, {pipeline_mode = #tpu.pipeline_mode<synchronous>, transform_indices = @transform_2, window_bounds = array<i64: 1, 32>}, {pipeline_mode = #tpu.pipeline_mode<synchronous>, transform_indices = @transform_3, window_bounds = array<i64: 8, 32>}, {transform_indices = @transform_4, window_bounds = array<i64: 1, 32, 96>}, {transform_indices = @transform_5, window_bounds = array<i64: 1, 1, 96>}, {transform_indices = @transform_6, window_bounds = array<i64: 1, 32, 32>}, {transform_indices = @transform_7, window_bounds = array<i64: 1, 1, 32>}, {transform_indices = @transform_8, window_bounds = array<i64: 1, 1, 32>}, {transform_indices = @transform_9, window_bounds = array<i64: 1, 1, 32>}, {transform_indices = @transform_10, window_bounds = array<i64: 1, 32, 64>}, {transform_indices = @transform_11, window_bounds = array<i64: 1, 1, 64>}, {transform_indices = @transform_12, window_bounds = array<i64: 1, 64, 32>}, {transform_indices = @transform_13, window_bounds = array<i64: 1, 1, 32>}, {transform_indices = @transform_14, window_bounds = array<i64: 1, 1, 32>}, {transform_indices = @transform_15, window_bounds = array<i64: 1, 1, 32>}, {pipeline_mode = #tpu.pipeline_mode<synchronous>, transform_indices = @transform_16, window_bounds = array<i64: 1, 32>}, {pipeline_mode = #tpu.pipeline_mode<synchronous>, transform_indices = @transform_17, window_bounds = array<i64: 1, 1>}, {pipeline_mode = #tpu.pipeline_mode<synchronous>, transform_indices = @transform_18, window_bounds = array<i64: 1, 16>}]} {
    %c0_i32 = arith.constant 0 : i32
    %0 = arith.cmpi eq, %arg0, %c0_i32 : i32
    %1 = arith.extui %0 : i1 to i32
    %c0_i32_0 = arith.constant 0 : i32
    %2 = arith.cmpi ne, %1, %c0_i32_0 : i32
    scf.if %2 {
      %c0_75 = arith.constant 0 : index
      %c0_76 = arith.constant 0 : index
      %c0_77 = arith.constant 0 : index
      %194 = vector.load %arg1[%c0_75, %c0_76, %c0_77] : memref<2x8x4xf32, #tpu.memory_space<vmem>>, vector<2x8x4xf32>
      %195 = vector.shape_cast %194 : vector<2x8x4xf32> to vector<16x4xf32>
      %196 = arith.truncf %195 : vector<16x4xf32> to vector<16x4xbf16>
      %c0_78 = arith.constant 0 : index
      %c0_79 = arith.constant 0 : index
      %197 = vector.load %arg2[%c0_78, %c0_79] : memref<4x32xbf16, #tpu.memory_space<vmem>>, vector<4x32xbf16>
      %cst_80 = arith.constant dense<0.000000e+00> : vector<16x32xf32>
      %198 = tpu.matmul %196, %197, %cst_80 {dimension_numbers = #tpu.dot_dimension_numbers<[1], [0], [0], [1], [0, 0, 1, 1], [], []>} : vector<16x4xbf16>, vector<4x32xbf16>, vector<16x32xf32> -> vector<16x32xf32>
      %c0_81 = arith.constant 0 : index
      %c0_82 = arith.constant 0 : index
      %199 = vector.load %arg3[%c0_81, %c0_82] : memref<1x32xf32, #tpu.memory_space<vmem>>, vector<1x32xf32>
      %200 = vector.broadcast %199 : vector<1x32xf32> to vector<16x32xf32>
      %201 = arith.addf %198, %200 : vector<16x32xf32>
      %cst_83 = arith.constant 5.65685415 : f32
      %202 = vector.broadcast %cst_83 : f32 to vector<16x32xf32>
      %203 = arith.mulf %201, %202 : vector<16x32xf32>
      %204 = vector.shape_cast %203 : vector<16x32xf32> to vector<2x8x32xf32>
      %c0_84 = arith.constant 0 : index
      %c0_85 = arith.constant 0 : index
      %205 = vector.load %arg4[%c0_84, %c0_85] : memref<8x32xf32, #tpu.memory_space<vmem>>, vector<8x32xf32>
      %206 = vector.shape_cast %205 : vector<8x32xf32> to vector<1x8x32xf32>
      %207 = vector.broadcast %206 : vector<1x8x32xf32> to vector<2x8x32xf32>
      %208 = arith.addf %204, %207 : vector<2x8x32xf32>
      %209 = vector.shape_cast %208 : vector<2x8x32xf32> to vector<16x32xf32>
      %c0_86 = arith.constant 0 : index
      %c0_87 = arith.constant 0 : index
      %210 = vector.load %arg20[%c0_86, %c0_87] : memref<16x32xf32, #tpu.memory_space<vmem>>, vector<16x32xf32>
      tpu.vector_store %arg20[%c0_86, %c0_87], %209 {strides = array<i32>} : memref<16x32xf32, #tpu.memory_space<vmem>>, vector<16x32xf32>,
    } else {
    }
    %c0 = arith.constant 0 : index
    %c0_1 = arith.constant 0 : index
    %3 = vector.load %arg20[%c0, %c0_1] : memref<16x32xf32, #tpu.memory_space<vmem>>, vector<16x32xf32>
    %4 = arith.truncf %3 : vector<16x32xf32> to vector<16x32xbf16>
    %c0_2 = arith.constant 0 : index
    %c0_3 = arith.constant 0 : index
    %c0_4 = arith.constant 0 : index
    %5 = vector.load %arg5[%c0_2, %c0_3, %c0_4] : memref<1x32x96xbf16, #tpu.memory_space<vmem>>, vector<1x32x96xbf16>
    %6 = vector.shape_cast %5 : vector<1x32x96xbf16> to vector<32x96xbf16>
    %cst = arith.constant dense<0.000000e+00> : vector<16x96xf32>
    %7 = tpu.matmul %4, %6, %cst {dimension_numbers = #tpu.dot_dimension_numbers<[1], [0], [0], [1], [0, 0, 1, 1], [], []>} : vector<16x32xbf16>, vector<32x96xbf16>, vector<16x96xf32> -> vector<16x96xf32>
    %c0_5 = arith.constant 0 : index
    %c0_6 = arith.constant 0 : index
    %c0_7 = arith.constant 0 : index
    %8 = vector.load %arg6[%c0_5, %c0_6, %c0_7] : memref<1x1x96xf32, #tpu.memory_space<vmem>>, vector<1x1x96xf32>
    %9 = vector.shape_cast %8 : vector<1x1x96xf32> to vector<1x96xf32>
    %10 = vector.broadcast %9 : vector<1x96xf32> to vector<16x96xf32>
    %11 = arith.addf %7, %10 : vector<16x96xf32>
    %12 = vector.extract_strided_slice %11 {offsets = [0, 0], sizes = [16, 8], strides = [1, 1]} : vector<16x96xf32> to vector<16x8xf32>
    %13 = vector.shape_cast %12 : vector<16x8xf32> to vector<2x8x8xf32>
    %14 = arith.truncf %13 : vector<2x8x8xf32> to vector<2x8x8xbf16>
    %15 = vector.extract_strided_slice %11 {offsets = [0, 32], sizes = [16, 8], strides = [1, 1]} : vector<16x96xf32> to vector<16x8xf32>
    %16 = vector.shape_cast %15 : vector<16x8xf32> to vector<2x8x8xf32>
    %17 = arith.truncf %16 : vector<2x8x8xf32> to vector<2x8x8xbf16>
    %18 = vector.extract_strided_slice %11 {offsets = [0, 64], sizes = [16, 8], strides = [1, 1]} : vector<16x96xf32> to vector<16x8xf32>
    %19 = vector.shape_cast %18 : vector<16x8xf32> to vector<2x8x8xf32>
    %20 = arith.truncf %19 : vector<2x8x8xf32> to vector<2x8x8xbf16>
    %cst_8 = arith.constant dense<0.000000e+00> : vector<2x8x8xf32>
    %21 = tpu.matmul %14, %17, %cst_8 {dimension_numbers = #tpu.dot_dimension_numbers<[2], [2], [1], [1], [0, 0, 0, 1, 1, 1], [0], [0]>} : vector<2x8x8xbf16>, vector<2x8x8xbf16>, vector<2x8x8xf32> -> vector<2x8x8xf32>
    %cst_9 = arith.constant 0.353553385 : f32
    %22 = vector.broadcast %cst_9 : f32 to vector<2x8x8xf32>
    %23 = arith.mulf %21, %22 : vector<2x8x8xf32>
    %cst_10 = arith.constant dense<0xFF800000> : vector<2x8xf32>
    %24 = vector.multi_reduction <maximumf>, %23, %cst_10 [2] : vector<2x8x8xf32> to vector<2x8xf32>
    %25 = vector.shape_cast %24 : vector<2x8xf32> to vector<2x8x1xf32>
    %26 = vector.broadcast %25 : vector<2x8x1xf32> to vector<2x8x8xf32>
    %27 = arith.subf %23, %26 : vector<2x8x8xf32>
    %28 = math.exp %27 : vector<2x8x8xf32>
    %cst_11 = arith.constant dense<0.000000e+00> : vector<2x8xf32>
    %29 = vector.multi_reduction <add>, %28, %cst_11 [2] : vector<2x8x8xf32> to vector<2x8xf32>
    %30 = vector.shape_cast %29 : vector<2x8xf32> to vector<2x8x1xf32>
    %31 = tpu.reciprocal %30 {approx = true} : vector<2x8x1xf32> -> vector<2x8x1xf32>
    %32 = vector.broadcast %31 : vector<2x8x1xf32> to vector<2x8x8xf32>
    %33 = arith.mulf %28, %32 : vector<2x8x8xf32>
    %34 = arith.truncf %33 : vector<2x8x8xf32> to vector<2x8x8xbf16>
    %cst_12 = arith.constant dense<0.000000e+00> : vector<2x8x8xf32>
    %35 = tpu.matmul %34, %20, %cst_12 {dimension_numbers = #tpu.dot_dimension_numbers<[2], [1], [1], [2], [0, 0, 0, 1, 1, 2], [0], [0]>} : vector<2x8x8xbf16>, vector<2x8x8xbf16>, vector<2x8x8xf32> -> vector<2x8x8xf32>
    %36 = vector.extract_strided_slice %11 {offsets = [0, 8], sizes = [16, 8], strides = [1, 1]} : vector<16x96xf32> to vector<16x8xf32>
    %37 = vector.shape_cast %36 : vector<16x8xf32> to vector<2x8x8xf32>
    %38 = arith.truncf %37 : vector<2x8x8xf32> to vector<2x8x8xbf16>
    %39 = vector.extract_strided_slice %11 {offsets = [0, 40], sizes = [16, 8], strides = [1, 1]} : vector<16x96xf32> to vector<16x8xf32>
    %40 = vector.shape_cast %39 : vector<16x8xf32> to vector<2x8x8xf32>
    %41 = arith.truncf %40 : vector<2x8x8xf32> to vector<2x8x8xbf16>
    %42 = vector.extract_strided_slice %11 {offsets = [0, 72], sizes = [16, 8], strides = [1, 1]} : vector<16x96xf32> to vector<16x8xf32>
    %43 = vector.shape_cast %42 : vector<16x8xf32> to vector<2x8x8xf32>
    %44 = arith.truncf %43 : vector<2x8x8xf32> to vector<2x8x8xbf16>
    %cst_13 = arith.constant dense<0.000000e+00> : vector<2x8x8xf32>
    %45 = tpu.matmul %38, %41, %cst_13 {dimension_numbers = #tpu.dot_dimension_numbers<[2], [2], [1], [1], [0, 0, 0, 1, 1, 1], [0], [0]>} : vector<2x8x8xbf16>, vector<2x8x8xbf16>, vector<2x8x8xf32> -> vector<2x8x8xf32>
    %cst_14 = arith.constant 0.353553385 : f32
    %46 = vector.broadcast %cst_14 : f32 to vector<2x8x8xf32>
    %47 = arith.mulf %45, %46 : vector<2x8x8xf32>
    %cst_15 = arith.constant dense<0xFF800000> : vector<2x8xf32>
    %48 = vector.multi_reduction <maximumf>, %47, %cst_15 [2] : vector<2x8x8xf32> to vector<2x8xf32>
    %49 = vector.shape_cast %48 : vector<2x8xf32> to vector<2x8x1xf32>
    %50 = vector.broadcast %49 : vector<2x8x1xf32> to vector<2x8x8xf32>
    %51 = arith.subf %47, %50 : vector<2x8x8xf32>
    %52 = math.exp %51 : vector<2x8x8xf32>
    %cst_16 = arith.constant dense<0.000000e+00> : vector<2x8xf32>
    %53 = vector.multi_reduction <add>, %52, %cst_16 [2] : vector<2x8x8xf32> to vector<2x8xf32>
    %54 = vector.shape_cast %53 : vector<2x8xf32> to vector<2x8x1xf32>
    %55 = tpu.reciprocal %54 {approx = true} : vector<2x8x1xf32> -> vector<2x8x1xf32>
    %56 = vector.broadcast %55 : vector<2x8x1xf32> to vector<2x8x8xf32>
    %57 = arith.mulf %52, %56 : vector<2x8x8xf32>
    %58 = arith.truncf %57 : vector<2x8x8xf32> to vector<2x8x8xbf16>
    %cst_17 = arith.constant dense<0.000000e+00> : vector<2x8x8xf32>
    %59 = tpu.matmul %58, %44, %cst_17 {dimension_numbers = #tpu.dot_dimension_numbers<[2], [1], [1], [2], [0, 0, 0, 1, 1, 2], [0], [0]>} : vector<2x8x8xbf16>, vector<2x8x8xbf16>, vector<2x8x8xf32> -> vector<2x8x8xf32>
    %60 = vector.extract_strided_slice %11 {offsets = [0, 16], sizes = [16, 8], strides = [1, 1]} : vector<16x96xf32> to vector<16x8xf32>
    %61 = vector.shape_cast %60 : vector<16x8xf32> to vector<2x8x8xf32>
    %62 = arith.truncf %61 : vector<2x8x8xf32> to vector<2x8x8xbf16>
    %63 = vector.extract_strided_slice %11 {offsets = [0, 48], sizes = [16, 8], strides = [1, 1]} : vector<16x96xf32> to vector<16x8xf32>
    %64 = vector.shape_cast %63 : vector<16x8xf32> to vector<2x8x8xf32>
    %65 = arith.truncf %64 : vector<2x8x8xf32> to vector<2x8x8xbf16>
    %66 = vector.extract_strided_slice %11 {offsets = [0, 80], sizes = [16, 8], strides = [1, 1]} : vector<16x96xf32> to vector<16x8xf32>
    %67 = vector.shape_cast %66 : vector<16x8xf32> to vector<2x8x8xf32>
    %68 = arith.truncf %67 : vector<2x8x8xf32> to vector<2x8x8xbf16>
    %cst_18 = arith.constant dense<0.000000e+00> : vector<2x8x8xf32>
    %69 = tpu.matmul %62, %65, %cst_18 {dimension_numbers = #tpu.dot_dimension_numbers<[2], [2], [1], [1], [0, 0, 0, 1, 1, 1], [0], [0]>} : vector<2x8x8xbf16>, vector<2x8x8xbf16>, vector<2x8x8xf32> -> vector<2x8x8xf32>
    %cst_19 = arith.constant 0.353553385 : f32
    %70 = vector.broadcast %cst_19 : f32 to vector<2x8x8xf32>
    %71 = arith.mulf %69, %70 : vector<2x8x8xf32>
    %cst_20 = arith.constant dense<0xFF800000> : vector<2x8xf32>
    %72 = vector.multi_reduction <maximumf>, %71, %cst_20 [2] : vector<2x8x8xf32> to vector<2x8xf32>
    %73 = vector.shape_cast %72 : vector<2x8xf32> to vector<2x8x1xf32>
    %74 = vector.broadcast %73 : vector<2x8x1xf32> to vector<2x8x8xf32>
    %75 = arith.subf %71, %74 : vector<2x8x8xf32>
    %76 = math.exp %75 : vector<2x8x8xf32>
    %cst_21 = arith.constant dense<0.000000e+00> : vector<2x8xf32>
    %77 = vector.multi_reduction <add>, %76, %cst_21 [2] : vector<2x8x8xf32> to vector<2x8xf32>
    %78 = vector.shape_cast %77 : vector<2x8xf32> to vector<2x8x1xf32>
    %79 = tpu.reciprocal %78 {approx = true} : vector<2x8x1xf32> -> vector<2x8x1xf32>
    %80 = vector.broadcast %79 : vector<2x8x1xf32> to vector<2x8x8xf32>
    %81 = arith.mulf %76, %80 : vector<2x8x8xf32>
    %82 = arith.truncf %81 : vector<2x8x8xf32> to vector<2x8x8xbf16>
    %cst_22 = arith.constant dense<0.000000e+00> : vector<2x8x8xf32>
    %83 = tpu.matmul %82, %68, %cst_22 {dimension_numbers = #tpu.dot_dimension_numbers<[2], [1], [1], [2], [0, 0, 0, 1, 1, 2], [0], [0]>} : vector<2x8x8xbf16>, vector<2x8x8xbf16>, vector<2x8x8xf32> -> vector<2x8x8xf32>
    %84 = vector.extract_strided_slice %11 {offsets = [0, 24], sizes = [16, 8], strides = [1, 1]} : vector<16x96xf32> to vector<16x8xf32>
    %85 = vector.shape_cast %84 : vector<16x8xf32> to vector<2x8x8xf32>
    %86 = arith.truncf %85 : vector<2x8x8xf32> to vector<2x8x8xbf16>
    %87 = vector.extract_strided_slice %11 {offsets = [0, 56], sizes = [16, 8], strides = [1, 1]} : vector<16x96xf32> to vector<16x8xf32>
    %88 = vector.shape_cast %87 : vector<16x8xf32> to vector<2x8x8xf32>
    %89 = arith.truncf %88 : vector<2x8x8xf32> to vector<2x8x8xbf16>
    %90 = vector.extract_strided_slice %11 {offsets = [0, 88], sizes = [16, 8], strides = [1, 1]} : vector<16x96xf32> to vector<16x8xf32>
    %91 = vector.shape_cast %90 : vector<16x8xf32> to vector<2x8x8xf32>
    %92 = arith.truncf %91 : vector<2x8x8xf32> to vector<2x8x8xbf16>
    %cst_23 = arith.constant dense<0.000000e+00> : vector<2x8x8xf32>
    %93 = tpu.matmul %86, %89, %cst_23 {dimension_numbers = #tpu.dot_dimension_numbers<[2], [2], [1], [1], [0, 0, 0, 1, 1, 1], [0], [0]>} : vector<2x8x8xbf16>, vector<2x8x8xbf16>, vector<2x8x8xf32> -> vector<2x8x8xf32>
    %cst_24 = arith.constant 0.353553385 : f32
    %94 = vector.broadcast %cst_24 : f32 to vector<2x8x8xf32>
    %95 = arith.mulf %93, %94 : vector<2x8x8xf32>
    %cst_25 = arith.constant dense<0xFF800000> : vector<2x8xf32>
    %96 = vector.multi_reduction <maximumf>, %95, %cst_25 [2] : vector<2x8x8xf32> to vector<2x8xf32>
    %97 = vector.shape_cast %96 : vector<2x8xf32> to vector<2x8x1xf32>
    %98 = vector.broadcast %97 : vector<2x8x1xf32> to vector<2x8x8xf32>
    %99 = arith.subf %95, %98 : vector<2x8x8xf32>
    %100 = math.exp %99 : vector<2x8x8xf32>
    %cst_26 = arith.constant dense<0.000000e+00> : vector<2x8xf32>
    %101 = vector.multi_reduction <add>, %100, %cst_26 [2] : vector<2x8x8xf32> to vector<2x8xf32>
    %102 = vector.shape_cast %101 : vector<2x8xf32> to vector<2x8x1xf32>
    %103 = tpu.reciprocal %102 {approx = true} : vector<2x8x1xf32> -> vector<2x8x1xf32>
    %104 = vector.broadcast %103 : vector<2x8x1xf32> to vector<2x8x8xf32>
    %105 = arith.mulf %100, %104 : vector<2x8x8xf32>
    %106 = arith.truncf %105 : vector<2x8x8xf32> to vector<2x8x8xbf16>
    %cst_27 = arith.constant dense<0.000000e+00> : vector<2x8x8xf32>
    %107 = tpu.matmul %106, %92, %cst_27 {dimension_numbers = #tpu.dot_dimension_numbers<[2], [1], [1], [2], [0, 0, 0, 1, 1, 2], [0], [0]>} : vector<2x8x8xbf16>, vector<2x8x8xbf16>, vector<2x8x8xf32> -> vector<2x8x8xf32>
    %108 = tpu.concatenate %35, %59, %83, %107 in 2 : vector<2x8x8xf32>, vector<2x8x8xf32>, vector<2x8x8xf32>, vector<2x8x8xf32> -> vector<2x8x32xf32>
    %109 = vector.shape_cast %108 : vector<2x8x32xf32> to vector<16x32xf32>
    %110 = arith.truncf %109 : vector<16x32xf32> to vector<16x32xbf16>
    %c0_28 = arith.constant 0 : index
    %c0_29 = arith.constant 0 : index
    %c0_30 = arith.constant 0 : index
    %111 = vector.load %arg7[%c0_28, %c0_29, %c0_30] : memref<1x32x32xbf16, #tpu.memory_space<vmem>>, vector<1x32x32xbf16>
    %112 = vector.shape_cast %111 : vector<1x32x32xbf16> to vector<32x32xbf16>
    %cst_31 = arith.constant dense<0.000000e+00> : vector<16x32xf32>
    %113 = tpu.matmul %110, %112, %cst_31 {dimension_numbers = #tpu.dot_dimension_numbers<[1], [0], [0], [1], [0, 0, 1, 1], [], []>} : vector<16x32xbf16>, vector<32x32xbf16>, vector<16x32xf32> -> vector<16x32xf32>
    %c0_32 = arith.constant 0 : index
    %c0_33 = arith.constant 0 : index
    %c0_34 = arith.constant 0 : index
    %114 = vector.load %arg8[%c0_32, %c0_33, %c0_34] : memref<1x1x32xf32, #tpu.memory_space<vmem>>, vector<1x1x32xf32>
    %115 = vector.shape_cast %114 : vector<1x1x32xf32> to vector<1x32xf32>
    %116 = vector.broadcast %115 : vector<1x32xf32> to vector<16x32xf32>
    %117 = arith.addf %113, %116 : vector<16x32xf32>
    %118 = arith.addf %3, %117 : vector<16x32xf32>
    %cst_35 = arith.constant dense<0.000000e+00> : vector<16xf32>
    %119 = vector.multi_reduction <add>, %118, %cst_35 [1] : vector<16x32xf32> to vector<16xf32>
    %120 = vector.shape_cast %119 : vector<16xf32> to vector<16x1xf32>
    %cst_36 = arith.constant 3.200000e+01 : f32
    %121 = vector.broadcast %cst_36 : f32 to vector<16x1xf32>
    %122 = arith.divf %120, %121 : vector<16x1xf32>
    %123 = vector.broadcast %122 : vector<16x1xf32> to vector<16x32xf32>
    %124 = arith.subf %118, %123 : vector<16x32xf32>
    %125 = arith.mulf %124, %124 : vector<16x32xf32>
    %cst_37 = arith.constant dense<0.000000e+00> : vector<16xf32>
    %126 = vector.multi_reduction <add>, %125, %cst_37 [1] : vector<16x32xf32> to vector<16xf32>
    %127 = vector.shape_cast %126 : vector<16xf32> to vector<16x1xf32>
    %cst_38 = arith.constant 3.200000e+01 : f32
    %128 = vector.broadcast %cst_38 : f32 to vector<16x1xf32>
    %129 = arith.divf %127, %128 : vector<16x1xf32>
    %130 = vector.broadcast %122 : vector<16x1xf32> to vector<16x32xf32>
    %131 = arith.subf %118, %130 : vector<16x32xf32>
    %cst_39 = arith.constant 9.99999974E-6 : f32
    %132 = vector.broadcast %cst_39 : f32 to vector<16x1xf32>
    %133 = arith.addf %129, %132 : vector<16x1xf32>
    %134 = math.rsqrt %133 : vector<16x1xf32>
    %135 = vector.broadcast %134 : vector<16x1xf32> to vector<16x32xf32>
    %136 = arith.mulf %131, %135 : vector<16x32xf32>
    %c0_40 = arith.constant 0 : index
    %c0_41 = arith.constant 0 : index
    %c0_42 = arith.constant 0 : index
    %137 = vector.load %arg9[%c0_40, %c0_41, %c0_42] : memref<1x1x32xf32, #tpu.memory_space<vmem>>, vector<1x1x32xf32>
    %138 = vector.shape_cast %137 : vector<1x1x32xf32> to vector<1x32xf32>
    %139 = vector.broadcast %138 : vector<1x32xf32> to vector<16x32xf32>
    %140 = arith.mulf %136, %139 : vector<16x32xf32>
    %c0_43 = arith.constant 0 : index
    %c0_44 = arith.constant 0 : index
    %c0_45 = arith.constant 0 : index
    %141 = vector.load %arg10[%c0_43, %c0_44, %c0_45] : memref<1x1x32xf32, #tpu.memory_space<vmem>>, vector<1x1x32xf32>
    %142 = vector.shape_cast %141 : vector<1x1x32xf32> to vector<1x32xf32>
    %143 = vector.broadcast %142 : vector<1x32xf32> to vector<16x32xf32>
    %144 = arith.addf %140, %143 : vector<16x32xf32>
    %145 = arith.truncf %144 : vector<16x32xf32> to vector<16x32xbf16>
    %c0_46 = arith.constant 0 : index
    %c0_47 = arith.constant 0 : index
    %c0_48 = arith.constant 0 : index
    %146 = vector.load %arg11[%c0_46, %c0_47, %c0_48] : memref<1x32x64xbf16, #tpu.memory_space<vmem>>, vector<1x32x64xbf16>
    %147 = vector.shape_cast %146 : vector<1x32x64xbf16> to vector<32x64xbf16>
    %cst_49 = arith.constant dense<0.000000e+00> : vector<16x64xf32>
    %148 = tpu.matmul %145, %147, %cst_49 {dimension_numbers = #tpu.dot_dimension_numbers<[1], [0], [0], [1], [0, 0, 1, 1], [], []>} : vector<16x32xbf16>, vector<32x64xbf16>, vector<16x64xf32> -> vector<16x64xf32>
    %c0_50 = arith.constant 0 : index
    %c0_51 = arith.constant 0 : index
    %c0_52 = arith.constant 0 : index
    %149 = vector.load %arg12[%c0_50, %c0_51, %c0_52] : memref<1x1x64xf32, #tpu.memory_space<vmem>>, vector<1x1x64xf32>
    %150 = vector.shape_cast %149 : vector<1x1x64xf32> to vector<1x64xf32>
    %151 = vector.broadcast %150 : vector<1x64xf32> to vector<16x64xf32>
    %152 = arith.addf %148, %151 : vector<16x64xf32>
    %cst_53 = arith.constant 0.000000e+00 : f32
    %153 = vector.broadcast %cst_53 : f32 to vector<16x64xf32>
    %154 = arith.maximumf %152, %153 : vector<16x64xf32>
    %155 = arith.truncf %154 : vector<16x64xf32> to vector<16x64xbf16>
    %c0_54 = arith.constant 0 : index
    %c0_55 = arith.constant 0 : index
    %c0_56 = arith.constant 0 : index
    %156 = vector.load %arg13[%c0_54, %c0_55, %c0_56] : memref<1x64x32xbf16, #tpu.memory_space<vmem>>, vector<1x64x32xbf16>
    %157 = vector.shape_cast %156 : vector<1x64x32xbf16> to vector<64x32xbf16>
    %cst_57 = arith.constant dense<0.000000e+00> : vector<16x32xf32>
    %158 = tpu.matmul %155, %157, %cst_57 {dimension_numbers = #tpu.dot_dimension_numbers<[1], [0], [0], [1], [0, 0, 1, 1], [], []>} : vector<16x64xbf16>, vector<64x32xbf16>, vector<16x32xf32> -> vector<16x32xf32>
    %c0_58 = arith.constant 0 : index
    %c0_59 = arith.constant 0 : index
    %c0_60 = arith.constant 0 : index
    %159 = vector.load %arg14[%c0_58, %c0_59, %c0_60] : memref<1x1x32xf32, #tpu.memory_space<vmem>>, vector<1x1x32xf32>
    %160 = vector.shape_cast %159 : vector<1x1x32xf32> to vector<1x32xf32>
    %161 = vector.broadcast %160 : vector<1x32xf32> to vector<16x32xf32>
    %162 = arith.addf %158, %161 : vector<16x32xf32>
    %163 = arith.addf %144, %162 : vector<16x32xf32>
    %cst_61 = arith.constant dense<0.000000e+00> : vector<16xf32>
    %164 = vector.multi_reduction <add>, %163, %cst_61 [1] : vector<16x32xf32> to vector<16xf32>
    %165 = vector.shape_cast %164 : vector<16xf32> to vector<16x1xf32>
    %cst_62 = arith.constant 3.200000e+01 : f32
    %166 = vector.broadcast %cst_62 : f32 to vector<16x1xf32>
    %167 = arith.divf %165, %166 : vector<16x1xf32>
    %168 = vector.broadcast %167 : vector<16x1xf32> to vector<16x32xf32>
    %169 = arith.subf %163, %168 : vector<16x32xf32>
    %170 = arith.mulf %169, %169 : vector<16x32xf32>
    %cst_63 = arith.constant dense<0.000000e+00> : vector<16xf32>
    %171 = vector.multi_reduction <add>, %170, %cst_63 [1] : vector<16x32xf32> to vector<16xf32>
    %172 = vector.shape_cast %171 : vector<16xf32> to vector<16x1xf32>
    %cst_64 = arith.constant 3.200000e+01 : f32
    %173 = vector.broadcast %cst_64 : f32 to vector<16x1xf32>
    %174 = arith.divf %172, %173 : vector<16x1xf32>
    %175 = vector.broadcast %167 : vector<16x1xf32> to vector<16x32xf32>
    %176 = arith.subf %163, %175 : vector<16x32xf32>
    %cst_65 = arith.constant 9.99999974E-6 : f32
    %177 = vector.broadcast %cst_65 : f32 to vector<16x1xf32>
    %178 = arith.addf %174, %177 : vector<16x1xf32>
    %179 = math.rsqrt %178 : vector<16x1xf32>
    %180 = vector.broadcast %179 : vector<16x1xf32> to vector<16x32xf32>
    %181 = arith.mulf %176, %180 : vector<16x32xf32>
    %c0_66 = arith.constant 0 : index
    %c0_67 = arith.constant 0 : index
    %c0_68 = arith.constant 0 : index
    %182 = vector.load %arg15[%c0_66, %c0_67, %c0_68] : memref<1x1x32xf32, #tpu.memory_space<vmem>>, vector<1x1x32xf32>
    %183 = vector.shape_cast %182 : vector<1x1x32xf32> to vector<1x32xf32>
    %184 = vector.broadcast %183 : vector<1x32xf32> to vector<16x32xf32>
    %185 = arith.mulf %181, %184 : vector<16x32xf32>
    %c0_69 = arith.constant 0 : index
    %c0_70 = arith.constant 0 : index
    %c0_71 = arith.constant 0 : index
    %186 = vector.load %arg16[%c0_69, %c0_70, %c0_71] : memref<1x1x32xf32, #tpu.memory_space<vmem>>, vector<1x1x32xf32>
    %187 = vector.shape_cast %186 : vector<1x1x32xf32> to vector<1x32xf32>
    %188 = vector.broadcast %187 : vector<1x32xf32> to vector<16x32xf32>
    %189 = arith.addf %185, %188 : vector<16x32xf32>
    %c0_72 = arith.constant 0 : index
    %c0_73 = arith.constant 0 : index
    %190 = vector.load %arg20[%c0_72, %c0_73] : memref<16x32xf32, #tpu.memory_space<vmem>>, vector<16x32xf32>
    tpu.vector_store %arg20[%c0_72, %c0_73], %189 {strides = array<i32>} : memref<16x32xf32, #tpu.memory_space<vmem>>, vector<16x32xf32>,
    %c1_i32 = arith.constant 1 : i32
    %191 = arith.cmpi eq, %arg0, %c1_i32 : i32
    %192 = arith.extui %191 : i1 to i32
    %c0_i32_74 = arith.constant 0 : i32
    %193 = arith.cmpi ne, %192, %c0_i32_74 : i32
    scf.if %193 {
      %c0_75 = arith.constant 0 : index
      %c0_76 = arith.constant 0 : index
      %194 = vector.load %arg17[%c0_75, %c0_76] : memref<1x32xf32, #tpu.memory_space<vmem>>, vector<1x32xf32>
      %cst_77 = arith.constant dense<0.000000e+00> : vector<1x16xf32>
      %195 = tpu.matmul %194, %189, %cst_77 {dimension_numbers = #tpu.dot_dimension_numbers<[1], [1], [0], [0], [0, 0, 1, 0], [], []>} : vector<1x32xf32>, vector<16x32xf32>, vector<1x16xf32> -> vector<1x16xf32>
      %c0_78 = arith.constant 0 : index
      %c0_79 = arith.constant 0 : index
      %196 = vector.load %arg18[%c0_78, %c0_79] : memref<1x1xf32, #tpu.memory_space<vmem>>, vector<1x1xf32>
      %197 = vector.broadcast %196 : vector<1x1xf32> to vector<1x16xf32>
      %198 = arith.addf %195, %197 : vector<1x16xf32>
      %c0_80 = arith.constant 0 : index
      %c0_81 = arith.constant 0 : index
      %199 = vector.load %arg19[%c0_80, %c0_81] : memref<1x16xf32, #tpu.memory_space<vmem>>, vector<1x16xf32>
      tpu.vector_store %arg19[%c0_80, %c0_81], %198 {strides = array<i32>} : memref<1x16xf32, #tpu.memory_space<vmem>>, vector<1x16xf32>,
    } else {
    }
    return
  }
  func.func @transform_0(%arg0: i32) -> (i32, i32, i32) {
    %c0_i32 = arith.constant 0 : i32
    %c0_i32_0 = arith.constant 0 : i32
    %c0_i32_1 = arith.constant 0 : i32
    %c0_i32_2 = arith.constant 0 : i32
    return %c0_i32, %c0_i32_0, %c0_i32_1 : i32, i32, i32
  }
  func.func @transform_1(%arg0: i32) -> (i32, i32) {
    %c0_i32 = arith.constant 0 : i32
    %c0_i32_0 = arith.constant 0 : i32
    %c0_i32_1 = arith.constant 0 : i32
    return %c0_i32, %c0_i32_0 : i32, i32
  }
  func.func @transform_2(%arg0: i32) -> (i32, i32) {
    %c0_i32 = arith.constant 0 : i32
    %c0_i32_0 = arith.constant 0 : i32
    %c0_i32_1 = arith.constant 0 : i32
    return %c0_i32, %c0_i32_0 : i32, i32
  }
  func.func @transform_3(%arg0: i32) -> (i32, i32) {
    %c0_i32 = arith.constant 0 : i32
    %c0_i32_0 = arith.constant 0 : i32
    %c0_i32_1 = arith.constant 0 : i32
    return %c0_i32, %c0_i32_0 : i32, i32
  }
  func.func @transform_4(%arg0: i32) -> (i32, i32, i32) {
    %c0_i32 = arith.constant 0 : i32
    %c0_i32_0 = arith.constant 0 : i32
    %c0_i32_1 = arith.constant 0 : i32
    return %arg0, %c0_i32, %c0_i32_0 : i32, i32, i32
  }
  func.func @transform_5(%arg0: i32) -> (i32, i32, i32) {
    %c0_i32 = arith.constant 0 : i32
    %c0_i32_0 = arith.constant 0 : i32
    %c0_i32_1 = arith.constant 0 : i32
    return %arg0, %c0_i32, %c0_i32_0 : i32, i32, i32
  }
  func.func @transform_6(%arg0: i32) -> (i32, i32, i32) {
    %c0_i32 = arith.constant 0 : i32
    %c0_i32_0 = arith.constant 0 : i32
    %c0_i32_1 = arith.constant 0 : i32
    return %arg0, %c0_i32, %c0_i32_0 : i32, i32, i32
  }
  func.func @transform_7(%arg0: i32) -> (i32, i32, i32) {
    %c0_i32 = arith.constant 0 : i32
    %c0_i32_0 = arith.constant 0 : i32
    %c0_i32_1 = arith.constant 0 : i32
    return %arg0, %c0_i32, %c0_i32_0 : i32, i32, i32
  }
  func.func @transform_8(%arg0: i32) -> (i32, i32, i32) {
    %c0_i32 = arith.constant 0 : i32
    %c0_i32_0 = arith.constant 0 : i32
    %c0_i32_1 = arith.constant 0 : i32
    return %arg0, %c0_i32, %c0_i32_0 : i32, i32, i32
  }
  func.func @transform_9(%arg0: i32) -> (i32, i32, i32) {
    %c0_i32 = arith.constant 0 : i32
    %c0_i32_0 = arith.constant 0 : i32
    %c0_i32_1 = arith.constant 0 : i32
    return %arg0, %c0_i32, %c0_i32_0 : i32, i32, i32
  }
  func.func @transform_10(%arg0: i32) -> (i32, i32, i32) {
    %c0_i32 = arith.constant 0 : i32
    %c0_i32_0 = arith.constant 0 : i32
    %c0_i32_1 = arith.constant 0 : i32
    return %arg0, %c0_i32, %c0_i32_0 : i32, i32, i32
  }
  func.func @transform_11(%arg0: i32) -> (i32, i32, i32) {
    %c0_i32 = arith.constant 0 : i32
    %c0_i32_0 = arith.constant 0 : i32
    %c0_i32_1 = arith.constant 0 : i32
    return %arg0, %c0_i32, %c0_i32_0 : i32, i32, i32
  }
  func.func @transform_12(%arg0: i32) -> (i32, i32, i32) {
    %c0_i32 = arith.constant 0 : i32
    %c0_i32_0 = arith.constant 0 : i32
    %c0_i32_1 = arith.constant 0 : i32
    return %arg0, %c0_i32, %c0_i32_0 : i32, i32, i32
  }
  func.func @transform_13(%arg0: i32) -> (i32, i32, i32) {
    %c0_i32 = arith.constant 0 : i32
    %c0_i32_0 = arith.constant 0 : i32
    %c0_i32_1 = arith.constant 0 : i32
    return %arg0, %c0_i32, %c0_i32_0 : i32, i32, i32
  }
  func.func @transform_14(%arg0: i32) -> (i32, i32, i32) {
    %c0_i32 = arith.constant 0 : i32
    %c0_i32_0 = arith.constant 0 : i32
    %c0_i32_1 = arith.constant 0 : i32
    return %arg0, %c0_i32, %c0_i32_0 : i32, i32, i32
  }
  func.func @transform_15(%arg0: i32) -> (i32, i32, i32) {
    %c0_i32 = arith.constant 0 : i32
    %c0_i32_0 = arith.constant 0 : i32
    %c0_i32_1 = arith.constant 0 : i32
    return %arg0, %c0_i32, %c0_i32_0 : i32, i32, i32
  }
  func.func @transform_16(%arg0: i32) -> (i32, i32) {
    %c0_i32 = arith.constant 0 : i32
    %c0_i32_0 = arith.constant 0 : i32
    %c0_i32_1 = arith.constant 0 : i32
    return %c0_i32, %c0_i32_0 : i32, i32
  }
  func.func @transform_17(%arg0: i32) -> (i32, i32) {
    %c0_i32 = arith.constant 0 : i32
    %c0_i32_0 = arith.constant 0 : i32
    %c0_i32_1 = arith.constant 0 : i32
    return %c0_i32, %c0_i32_0 : i32, i32
  }
  func.func @transform_18(%arg0: i32) -> (i32, i32) {
    %c0_i32 = arith.constant 0 : i32
    %c0_i32_0 = arith.constant 0 : i32
    %c0_i32_1 = arith.constant 0 : i32
    return %c0_i32, %c0_i32_0 : i32, i32
  }
}

</mosaic_0001>

<bundles_post_ra>
// kernel: tpu_custom_call.1
= control target key start
LH: loop header
LB: loop body
LE: loop exit
PB: predicated region body
PF: predicated region fallthrough
CT: control target
= control target key end

     0   :  { %s3244_s0 = inlined_call_operand.vmem [shape: f32[2,8,4], index: 0, kind: input, shape index: {}]   ;;  %s3245_s1 = inlined_call_operand.vmem [shape: bf16[4,32], index: 1, kind: input, shape index: {}]   ;;  %s3246_s2 = inlined_call_operand.vmem [shape: f32[1,32], index: 2, kind: input, shape index: {}]   ;;  %s3247_s3 = inlined_call_operand.vmem [shape: f32[8,32], index: 3, kind: input, shape index: {}]   ;;  %s3248_s4 = inlined_call_operand.vmem [shape: bf16[2,32,96], index: 4, kind: input, shape index: {}]   ;;  %s3249_s5 = inlined_call_operand.vmem [shape: f32[2,1,96], index: 5, kind: input, shape index: {}]   ;;  %s3250_s6 = inlined_call_operand.vmem [shape: bf16[2,32,32], index: 6, kind: input, shape index: {}]   ;;  %s3251_s7 = inlined_call_operand.vmem [shape: f32[2,1,32], index: 7, kind: input, shape index: {}]   ;;  %s3252_s8 = inlined_call_operand.vmem [shape: f32[2,1,32], index: 8, kind: input, shape index: {}]   ;;  %s3253_s9 = inlined_call_operand.vmem [shape: f32[2,1,32], index: 9, kind: input, shape index: {}]   ;;  %s3254_s10 = inlined_call_operand.vmem [shape: bf16[2,32,64], index: 10, kind: input, shape index: {}]   ;;  %s3255_s11 = inlined_call_operand.vmem [shape: f32[2,1,64], index: 11, kind: input, shape index: {}]   ;;  %s3256_s12 = inlined_call_operand.vmem [shape: bf16[2,64,32], index: 12, kind: input, shape index: {}]   ;;  %s3257_s13 = inlined_call_operand.vmem [shape: f32[2,1,32], index: 13, kind: input, shape index: {}]   ;;  %s3258_s14 = inlined_call_operand.vmem [shape: f32[2,1,32], index: 14, kind: input, shape index: {}]   ;;  %s3259_s15 = inlined_call_operand.vmem [shape: f32[2,1,32], index: 15, kind: input, shape index: {}]   ;;  %s3260_s16 = inlined_call_operand.vmem [shape: f32[1,32], index: 16, kind: input, shape index: {}]   ;;  %s3261_s17 = inlined_call_operand.<no memory space> [shape: f32[1,1], index: 17, kind: input, shape index: {}]   ;;  %s3262_s18 = inlined_call_operand.hbm [shape: f32[1,16], index: 18, kind: output, shape index: {}]  }
   0x1   :  { %3267 = sst [smem:[#allocation9_spill]] %s3244_s0  ;;  %v23_v0 = vstv %s3261_s17 }
   0x2   :  { %3268 = sst [smem:[#allocation10_spill]] %s3245_s1  ;;  %24 = vst [vmem:[#allocation3] sm:$0x1] %v23_v0 }
   0x3   :  { %3269 = sst [smem:[#allocation11_spill]] %s3246_s2 }
   0x4   :  { %3270 = sst [smem:[#allocation12_spill]] %s3248_s4 }
   0x5   :  { %3271 = sst [smem:[#allocation13_spill]] %s3250_s6 }
   0x6   :  { %3272 = sst [smem:[#allocation14_spill]] %s3260_s16 }
   0x7   :  { %3273 = sst [smem:[#allocation15_spill]] %s3262_s18 }
   0x8   :  { %25 = vsyncpa [#allocation5], 0  ;;  %s2897_s29 = smov 0  }
   0x9 LB: > { %3274 = sst [smem:[#allocation7_spill]] %s2774_s29  ;;  %s2903_s30 = sadd.s32 4294967295, %s2774_s29   ;;  %s2774_s29 = sphi %s2897_s29, %s31_s29  }
   0xa   : > { %p2373_p0 = scmp.ge.s32.totalorder %s2774_s29, 1  ;;  %p604_p1 = scmp.lt.s32.totalorder %s2774_s29, 3 }
   0xc   : > { %p605_p2 = pnand %p2373_p0, %p604_p1 }
   0xe   : > { %608 = sbr.rel (%p605_p2) target bundleno = 4629 (0x1215), region = 92 }
  0x15   : > { %p692_p3 = scmp.lt.s32.totalorder %s2903_s30, 1  ;;  %s3275_s4 = sld [smem:[#allocation12_spill]] }
  0x16   : > { %s3276_s6 = sld [smem:[#allocation13_spill]]  ;;  %p2382_p4 = scmp.ne.s32.totalorder %s2903_s30, 0 }
  0x17   : > { %s2909_s17 = scalar_select %p692_p3, %s2903_s30, 1 }
  0x18   : > { %740 = sbr.rel (%p2382_p4) target bundleno = 260 (0x104), region = 96  ;;  %s3278_s26 = sld [smem:[#allocation10_spill]] (!%p2382_p4)  ;;  %vm756_vm0 = vcmask (!%p2382_p4), 1041408   ;;  %v2776_v3 = vmov (!%p2382_p4), 0.0   ;;  %vm2777_vm1 = vmmov (!%p2382_p4), 0   ;;  %vm752_vm2 = vcmask (!%p2382_p4), 31744  }
  0x19   : > { %s2431_s0 = sshll.u32 %s2909_s17, 4  ;;  %s729_s19 = scalar_lea.vmem %s3257_s13, %s2909_s17  ;;  %2486 = vmatprep.subr.bf16.mxu0 (!%p2382_p4), %v2776_v3  ;;  %2488 = vmatprep.mubr.msk.bf16.mxu0 (!%p2382_p4), %vm2777_vm1, %v2776_v3  ;;  %v803_v11 = vld [vmem:[%s3247_s3] sm:$0xff] (!%p2382_p4)  ;;  %vm806_vm3 = vcmask (!%p2382_p4), 261120  }
  0x1a   : > { %s732_s21 = scalar_lea.vmem %s3258_s14, %s2909_s17  ;;  %s735_s16 = scalar_lea.vmem %s3259_s15, %s2909_s17 }
  0x1b   : > { %s2919_s2 = scalar_lea.vmem %s3275_s4, %s2431_s0  ;;  %s2941_s4 = scalar_lea.vmem %s3254_s10, %s2431_s0 }
  0x1c   : > { %s2924_s25 = scalar_lea.vmem %s3276_s6, %s2431_s0  ;;  %s721_s6 = scalar_lea.vmem %s3255_s11, %s2909_s17 }
  0x1d   : > { %3277 = sst [smem:[#allocation8_spill]] %s2924_s25  ;;  %s2434_s25 = sshll.u32 %s2909_s17, 5 }
  0x1e   : > { %s2951_s28 = scalar_lea.vmem %s3256_s12, %s2434_s25  ;;  %v744_v1 = vld [vmem:[%s3278_s26] sm:$0x3] (!%p2382_p4)  ;;  %s3279_s18 = sld [smem:[#allocation9_spill]] (!%p2382_p4) }
  0x1f   : > { %v758_v4 = vsel %vm756_vm0, %v744_v1, 0  ;;  %s3280_s22 = sld [smem:[#allocation11_spill]] }
  0x20   : > { %2487 = vmatpush3.bf16.msra.mxu0 %v758_v4 }
  0x24   : > { %v741_v2 = vld [vmem:[%s3279_s18] sm:$0xff]  ;;  %v742_v5 = vld [vmem:[%s3279_s18 + $0x8] sm:$0xff] }
  0x25   : > { %v743_v6 = vpack.c.bf16 %v742_v5, %v741_v2  ;;  %v2383_v7 = vld [vmem:[%s3280_s22] ss:$0 sm:$0xff] }
  0x27   : > { %2489 = vmatmul.mubr.msk.bf16.vlgmr.msra.gmra.mrb[0].mxu0 %vm752_vm2, %v743_v6 }
  0xfa   : > { %v794_v8 = vpop.f32.mrb[0].mxu0 }
  0xfb   : > { %v795_v9 = vadd.f32 %v2383_v7, %v794_v8  ;;  %v2490_v10 = vpop.f32.mrb[1].mxu0 }
  0xfc   : > { %v797_v12 = vpop.f32.mrb[2].mxu0 }
  0xfd   : > { %v801_v13 = vmul.f32 5.656854, %v795_v9  ;;  %v798_v14 = vadd.f32 %v2383_v7, %v797_v12  ;;  %v2491_v15 = vpop.f32.mrb[3].mxu0 }
  0xff   : > { %v804_v16 = vadd.f32 %v803_v11, %v801_v13  ;;  %v802_v17 = vmul.f32 5.656854, %v798_v14 }
 0x101   : > { %807 = vst.msk [vmem:[#allocation2] sm:$0xff] %vm806_vm3, %v804_v16  ;;  %v805_v18 = vadd.f32 %v803_v11, %v802_v17 }
 0x103   : > { %808 = vst.msk [vmem:[#allocation2 + $0x8] sm:$0xff] %vm806_vm3, %v805_v18 }
 0x104 PF: > { %v2687_v19 = vld [vmem:[%s2919_s2] sm:$0xff]   ;;  %v2778_v20 = vmov 0.0   ;;  %v2688_v21 = vld [vmem:[%s2919_s2 + $0x8] sm:$0xff]   ;;  %vm2779_vm4 = vmmov 0   ;;  %vm835_vm5 = vcmask 261120   ;;  %s3281_s25 = scalar_lea.vmem %s3249_s5, %s2909_s17  ;;  %s2780_s27 = smov 96  }
 0x105   : > { %2492 = vmatprep.subr.bf16.mxu0 %v2778_v20  ;;  %2500 = vmatprep.subr.bf16.mxu1 %v2778_v20  ;;  %v2385_v25 = vld [vmem:[%s3281_s25] ss:$0 sm:$0xff]  ;;  %vm885_vm6 = vcmask 64512   ;;  %s2781_s20 = smov 64   ;;  %s2782_s29 = smov 88   ;;  %vm1012_vm7 = vcmask 1043456  }
 0x106   : > { %2493 = vmatpush3.bf16.msra.mxu0 %v2687_v19  ;;  %2496 = vmatprep.mubr.msk.bf16.mxu0 %vm2779_vm4, %v2778_v20  ;;  %s2783_s1 = smov 120   ;;  %s2784_s0 = smov 56   ;;  %vm1796_vm8 = vcmask 130048   ;;  %vm1799_vm9 = vcmask 195584   ;;  %vm2027_vm10 = vcmask 523264  }
 0x107   : > { %2494 = vmatprep.subr.bf16.mxu0 %v2778_v20  ;;  %2502 = vmatprep.mubr.msk.bf16.mxu1 %vm2779_vm4, %v2778_v20  ;;  %s2785_s22 = smov 80   ;;  %s2786_s23 = smov 112  }
 0x108   : > { %v2987_v22 = vld [vmem:[#allocation2] sm:$0xff]  ;;  %s2787_s24 = smov 48   ;;  %s2788_s2 = smov 72  }
 0x109   : > { %s2789_s26 = smov 104   ;;  %s2790_s25 = smov 40  }
 0x10a   : > { %v2989_v23 = vld [vmem:[#allocation2 + $0x8] sm:$0xff]  ;;  %2495 = vmatpush3.bf16.msra.mxu0 %v2688_v21  ;;  %p2423_p5 = scmp.ne.s32.totalorder %s2903_s30, 1 }
 0x10b   : > { %v811_v24 = vpack.c.bf16 %v2989_v23, %v2987_v22  ;;  %2506 = vmatprep.subr.bf16.mxu0 %v2778_v20  ;;  %vm2633_vm11 = vmpackc.low (!%p2423_p5), %vm835_vm5, %vm835_vm5  ;;  %vm2795_vm12 = vmmov (!%p2423_p5), 0   ;;  %vm2214_vm13 = vcmask (!%p2423_p5), 122880  }
 0x10d   : > { %2497 = vmatmul.mubr.msk.bf16.vlgmr.msra.gmra.mrb[0].mxu0 %vm835_vm5, %v811_v24 }
 0x10e   : > { %2508 = vmatprep.mubr.msk.bf16.mxu0 %vm2779_vm4, %v2778_v20 }
 0x1e0   : > { %v873_v26 = vpop.f32.mrb[0].mxu0 }
 0x1e1   : > { %v874_v27 = vadd.f32 %v2385_v25, %v873_v26  ;;  %v2498_v28 = vpop.f32.mrb[1].mxu0 }
 0x1e2   : > { %v876_v29 = vpop.f32.mrb[2].mxu0 }
 0x1e3   : > { %v3005_v30 = vpack.c.bf16 %v874_v27, %v874_v27  ;;  %v877_v31 = vadd.f32 %v2385_v25, %v876_v29  ;;  %v2499_v32 = vpop.f32.mrb[3].mxu0 }
 0x1e5   : > { %883 = vrot.lane.b32.xlu0 %v3005_v30, %s2780_s27  ;;  %v3008_v33 = vpack.c.bf16 %v877_v31, %v877_v31 }
 0x1e9   : > { %933 = vrot.lane.b32.xlu0 %v3008_v33, %s2780_s27  ;;  %s2791_s27 = smov 8  }
 0x257   : > { %v884_v34 = vpop.permute.xlu0 %883 }
 0x258   : > { %v890_v35 = vsel %vm885_vm6, %v884_v34, 0 }
 0x259   : > { %2501 = vmatpush3.bf16.xpose.msra.mxu1 %v890_v35 }
 0x25a   : > { %2512 = vmatprep.subr.bf16.mxu1 %v2778_v20 }
 0x25b   : > { %v934_v36 = vpop.permute.xlu0 %933 }
 0x25c   : > { %v939_v37 = vsel %vm885_vm6, %v934_v36, 0 }
 0x25d   : > { %2507 = vmatpush3.bf16.xpose.msra.mxu0 %v939_v37 }
 0x25e   : > { %2518 = vmatprep.subr.bf16.mxu0 %v2778_v20 }
 0x260   : > { %2503 = vmatmul.mubr.msk.bf16.vlgmr.msra.gmra.mrb[0].mxu1 %vm885_vm6, %v3005_v30 }
 0x261   : > { %2514 = vmatprep.mubr.msk.bf16.mxu1 %vm2779_vm4, %v2778_v20 }
 0x264   : > { %2509 = vmatmul.mubr.msk.bf16.vlgmr.msra.gmra.mrb[4].mxu0 %vm885_vm6, %v3008_v33 }
 0x265   : > { %2520 = vmatprep.mubr.msk.bf16.mxu0 %vm2779_vm4, %v2778_v20 }
 0x333   : > { %v926_v38 = vpop.f32.mrb[0].mxu1 }
 0x334   : > { %v981_v39 = vmul.f32 0.35355338, %v926_v38  ;;  %v2504_v40 = vpop.f32.mrb[1].mxu1 }
 0x335   : > { %v929_v41 = vpop.f32.mrb[2].mxu1 }
 0x336   : > { %v2505_v42 = vpop.f32.mrb[3].mxu1  ;;  %v983_v43 = vsel %vm885_vm6, %v981_v39, -inf }
 0x337   : > { %984 = vmax.xlane.f32.xlu1 %v983_v43  ;;  %v975_v44 = vpop.f32.mrb[4].mxu0 }
 0x338   : > { %v982_v45 = vmul.f32 0.35355338, %v975_v44  ;;  %v2510_v46 = vpop.f32.mrb[5].mxu0 }
 0x339   : > { %v978_v47 = vpop.f32.mrb[6].mxu0 }
 0x33a   : > { %v2511_v48 = vpop.f32.mrb[7].mxu0  ;;  %v986_v49 = vsel %vm885_vm6, %v982_v45, -inf }
 0x33b   : > { %987 = vmax.xlane.f32.xlu1 %v986_v49 }
 0x34c   : > { %1007 = vrot.lane.b32.xlu1 %v3005_v30, %s2781_s20 }
 0x350   : > { %1056 = vrot.lane.b32.xlu1 %v3008_v33, %s2781_s20  ;;  %s2792_s20 = smov 16  }
 0x354   : > { %1106 = vrot.lane.b32.xlu1 %v3005_v30, %s2782_s29 }
 0x3c4   : > { %v985_v50 = vpop.xlane.xlu1 %984 }
 0x3c5   : > { %v989_v51 = vsub.f32 %v981_v39, %v985_v50 }
 0x3c7   : > { %v991_v52 = vmul.f32 1.442695, %v989_v51 }
 0x3c8   : > { %v988_v53 = vpop.xlane.xlu1 %987 }
 0x3c9   : > { %2697 = vpow2.f32 %v991_v52  ;;  %v990_v54 = vsub.f32 %v982_v45, %v988_v53 }
 0x3cb   : > { %v993_v55 = vmul.f32 1.442695, %v990_v54 }
 0x3cc   : > { %v1008_v56 = vpop.permute.xlu1 %1007 }
 0x3cd   : > { %2699 = vpow2.f32 %v993_v55  ;;  %v1014_v57 = vsel %vm1012_vm7, %v1008_v56, 0 }
 0x3ce   : > { %2513 = vmatpush3.bf16.msra.mxu1 %v1014_v57 }
 0x3cf   : > { %2524 = vmatprep.subr.bf16.mxu1 %v2778_v20 }
 0x3d0   : > { %v1057_v58 = vpop.permute.xlu1 %1056 }
 0x3d1   : > { %v1062_v59 = vsel %vm1012_vm7, %v1057_v58, 0 }
 0x3d2   : > { %2519 = vmatpush3.bf16.msra.mxu0 %v1062_v59 }
 0x3d3   : > { %v2698_v60 = vpop.eup %2697  ;;  %2530 = vmatprep.subr.bf16.mxu0 %v2778_v20 }
 0x3d4   : > { %v995_v61 = vsel %vm885_vm6, %v2698_v60, 0.0  ;;  %v1107_v0 = vpop.permute.xlu1 %1106 }
 0x3d5   : > { %996 = vadd.xlane.f32.xlu0 %v995_v61  ;;  %v1112_v7 = vsel %vm885_vm6, %v1107_v0, 0 }
 0x3d7   : > { %v2700_v62 = vpop.eup %2699 }
 0x3d8   : > { %v998_v63 = vsel %vm885_vm6, %v2700_v62, 0.0 }
 0x3d9   : > { %999 = vadd.xlane.f32.xlu1 %v998_v63 }
 0x3ea   : > { %1156 = vrot.lane.b32.xlu1 %v3008_v33, %s2782_s29  ;;  %s3282_s29 = sld [smem:[#allocation8_spill]] }
 0x3eb   : > { %1104 = vrot.lane.b32.xlu0 %v3005_v30, %s2783_s1 }
 0x3ee   : > { %1154 = vrot.lane.b32.xlu1 %v3008_v33, %s2783_s1  ;;  %s2793_s1 = smov 24  }
 0x462   : > { %v997_v1 = vpop.xlane.xlu0 %996 }
 0x463   : > { %2701 = vrcp.f32 %v997_v1 }
 0x466   : > { %v1000_v2 = vpop.xlane.xlu1 %999  ;;  %v1105_v12 = vpop.permute.xlu0 %1104 }
 0x467   : > { %2703 = vrcp.f32 %v1000_v2 }
 0x46a   : > { %v1157_v9 = vpop.permute.xlu1 %1156 }
 0x46b   : > { %v1162_v11 = vsel %vm885_vm6, %v1157_v9, 0 }
 0x46d   : > { %v2702_v3 = vpop.eup %2701 }
 0x46e   : > { %v1003_v4 = vmul.f32 %v2702_v3, %v2698_v60  ;;  %v1155_v13 = vpop.permute.xlu1 %1154 }
 0x470   : > { %v1005_v5 = vpack.c.bf16 %v1003_v4, %v1003_v4 }
 0x471   : > { %v2704_v6 = vpop.eup %2703 }
 0x472   : > { %v1004_v8 = vmul.f32 %v2704_v6, %v2700_v62  ;;  %2515 = vmatmul.mubr.msk.bf16.vlgmr.msra.gmra.mrb[4].mxu1 %vm885_vm6, %v1005_v5 }
 0x473   : > { %2525 = vmatpush3.bf16.xpose.msra.mxu1 %v1112_v7  ;;  %2526 = vmatprep.mubr.msk.bf16.mxu1 %vm2779_vm4, %v2778_v20 }
 0x474   : > { %v1006_v10 = vpack.c.bf16 %v1004_v8, %v1004_v8  ;;  %2536 = vmatprep.subr.bf16.mxu1 %v2778_v20 }
 0x476   : > { %2521 = vmatmul.mubr.msk.bf16.vlgmr.msra.gmra.mrb[8].mxu0 %vm885_vm6, %v1006_v10 }
 0x477   : > { %2531 = vmatpush3.bf16.xpose.msra.mxu0 %v1162_v11  ;;  %2532 = vmatprep.mubr.msk.bf16.mxu0 %vm2779_vm4, %v2778_v20 }
 0x478   : > { %2542 = vmatprep.subr.bf16.mxu0 %v2778_v20 }
 0x47a   : > { %2527 = vmatmul.mubr.msk.bf16.vlgmr.msra.gmra.mrb[8].mxu1 %vm885_vm6, %v1105_v12 }
 0x47b   : > { %2538 = vmatprep.mubr.msk.bf16.mxu1 %vm2779_vm4, %v2778_v20 }
 0x47e   : > { %2533 = vmatmul.mubr.msk.bf16.vlgmr.msra.gmra.mrb[12].mxu0 %vm885_vm6, %v1155_v13 }
 0x47f   : > { %2544 = vmatprep.mubr.msk.bf16.mxu0 %vm2779_vm4, %v2778_v20 }
 0x545   : > { %v3053_v14 = vpop.f32.mrb[4].mxu1 }
 0x546   : > { %v2516_v15 = vpop.f32.mrb[5].mxu1 }
 0x547   : > { %v1053_v16 = vpop.f32.mrb[6].mxu1 }
 0x548   : > { %v2517_v17 = vpop.f32.mrb[7].mxu1 }
 0x549   : > { %v3055_v18 = vpop.f32.mrb[8].mxu0 }
 0x54a   : > { %v2522_v19 = vpop.f32.mrb[9].mxu0 }
 0x54b   : > { %v1101_v21 = vpop.f32.mrb[10].mxu0 }
 0x54c   : > { %v2523_v24 = vpop.f32.mrb[11].mxu0 }
 0x54d   : > { %v1148_v25 = vpop.f32.mrb[8].mxu1 }
 0x54e   : > { %v1204_v26 = vmul.f32 0.35355338, %v1148_v25  ;;  %v2528_v27 = vpop.f32.mrb[9].mxu1 }
 0x54f   : > { %v1151_v28 = vpop.f32.mrb[10].mxu1 }
 0x550   : > { %v2529_v29 = vpop.f32.mrb[11].mxu1  ;;  %v1206_v31 = vsel %vm885_vm6, %v1204_v26, -inf }
 0x551   : > { %1207 = vmax.xlane.f32.xlu1 %v1206_v31  ;;  %v1198_v32 = vpop.f32.mrb[12].mxu0 }
 0x552   : > { %v1205_v34 = vmul.f32 0.35355338, %v1198_v32  ;;  %v2534_v35 = vpop.f32.mrb[13].mxu0 }
 0x553   : > { %v1201_v36 = vpop.f32.mrb[14].mxu0 }
 0x554   : > { %v2535_v37 = vpop.f32.mrb[15].mxu0  ;;  %v1209_v38 = vsel %vm885_vm6, %v1205_v34, -inf }
 0x555   : > { %1210 = vmax.xlane.f32.xlu0 %v1209_v38 }
 0x562   : > { %1230 = vrot.lane.b32.xlu1 %v3005_v30, %s2784_s0 }
 0x566   : > { %1328 = vrot.lane.b32.xlu1 %v3005_v30, %s2785_s22 }
 0x56b   : > { %1278 = vrot.lane.b32.xlu0 %v3008_v33, %s2784_s0 }
 0x56f   : > { %1326 = vrot.lane.b32.xlu0 %v3005_v30, %s2786_s23 }
 0x5de   : > { %v1208_v39 = vpop.xlane.xlu1 %1207 }
 0x5df   : > { %v1212_v40 = vsub.f32 %v1204_v26, %v1208_v39 }
 0x5e1   : > { %v1214_v41 = vmul.f32 1.442695, %v1212_v40 }
 0x5e2   : > { %v1231_v42 = vpop.permute.xlu1 %1230  ;;  %v1211_v43 = vpop.xlane.xlu0 %1210 }
 0x5e3   : > { %2705 = vpow2.f32 %v1214_v41  ;;  %v1236_v44 = vsel %vm1012_vm7, %v1231_v42, 0  ;;  %v1213_v45 = vsub.f32 %v1205_v34, %v1211_v43 }
 0x5e4   : > { %2537 = vmatpush3.bf16.msra.mxu1 %v1236_v44 }
 0x5e5   : > { %v1216_v46 = vmul.f32 1.442695, %v1213_v45  ;;  %2548 = vmatprep.subr.bf16.mxu1 %v2778_v20 }
 0x5e6   : > { %v1279_v47 = vpop.permute.xlu0 %1278  ;;  %v1329_v53 = vpop.permute.xlu1 %1328 }
 0x5e7   : > { %2707 = vpow2.f32 %v1216_v46  ;;  %v1284_v48 = vsel %vm1012_vm7, %v1279_v47, 0  ;;  %v1334_v60 = vsel %vm885_vm6, %v1329_v53, 0 }
 0x5e8   : > { %2543 = vmatpush3.bf16.msra.mxu0 %v1284_v48 }
 0x5e9   : > { %2554 = vmatprep.subr.bf16.mxu0 %v2778_v20 }
 0x5ea   : > { %v1327_v1 = vpop.permute.xlu0 %1326 }
 0x5ed   : > { %v2706_v49 = vpop.eup %2705 }
 0x5ee   : > { %v1218_v50 = vsel %vm885_vm6, %v2706_v49, 0.0 }
 0x5ef   : > { %1219 = vadd.xlane.f32.xlu1 %v1218_v50 }
 0x5f1   : > { %v2708_v51 = vpop.eup %2707 }
 0x5f2   : > { %v1221_v52 = vsel %vm885_vm6, %v2708_v51, 0.0 }
 0x5f3   : > { %1222 = vadd.xlane.f32.xlu1 %v1221_v52 }
 0x604   : > { %1378 = vrot.lane.b32.xlu1 %v3008_v33, %s2785_s22 }
 0x608   : > { %1376 = vrot.lane.b32.xlu1 %v3008_v33, %s2786_s23  ;;  %s3283_s23 = scalar_lea.vmem %s3251_s7, %s2909_s17 }
 0x67c   : > { %v1220_v54 = vpop.xlane.xlu1 %1219 }
 0x67d   : > { %2709 = vrcp.f32 %v1220_v54 }
 0x680   : > { %v1223_v55 = vpop.xlane.xlu1 %1222 }
 0x681   : > { %2711 = vrcp.f32 %v1223_v55 }
 0x684   : > { %v1379_v62 = vpop.permute.xlu1 %1378 }
 0x685   : > { %v1384_v0 = vsel %vm885_vm6, %v1379_v62, 0 }
 0x687   : > { %v2710_v56 = vpop.eup %2709 }
 0x688   : > { %v1226_v57 = vmul.f32 %v2710_v56, %v2706_v49  ;;  %v1377_v2 = vpop.permute.xlu1 %1376 }
 0x68a   : > { %v1228_v58 = vpack.c.bf16 %v1226_v57, %v1226_v57 }
 0x68b   : > { %v2712_v59 = vpop.eup %2711 }
 0x68c   : > { %v1227_v61 = vmul.f32 %v2712_v59, %v2708_v51  ;;  %2539 = vmatmul.mubr.msk.bf16.vlgmr.msra.gmra.mrb[12].mxu1 %vm885_vm6, %v1228_v58 }
 0x68d   : > { %2549 = vmatpush3.bf16.xpose.msra.mxu1 %v1334_v60  ;;  %2550 = vmatprep.mubr.msk.bf16.mxu1 %vm2779_vm4, %v2778_v20 }
 0x68e   : > { %v1229_v63 = vpack.c.bf16 %v1227_v61, %v1227_v61  ;;  %2560 = vmatprep.subr.bf16.mxu1 %v2778_v20 }
 0x690   : > { %2545 = vmatmul.mubr.msk.bf16.vlgmr.msra.gmra.mrb[16].mxu0 %vm885_vm6, %v1229_v63 }
 0x691   : > { %2555 = vmatpush3.bf16.xpose.msra.mxu0 %v1384_v0  ;;  %2556 = vmatprep.mubr.msk.bf16.mxu0 %vm2779_vm4, %v2778_v20 }
 0x692   : > { %2566 = vmatprep.subr.bf16.mxu0 %v2778_v20 }
 0x694   : > { %2551 = vmatmul.mubr.msk.bf16.vlgmr.msra.gmra.mrb[16].mxu1 %vm885_vm6, %v1327_v1 }
 0x695   : > { %2562 = vmatprep.mubr.msk.bf16.mxu1 %vm2779_vm4, %v2778_v20 }
 0x698   : > { %2557 = vmatmul.mubr.msk.bf16.vlgmr.msra.gmra.mrb[20].mxu0 %vm885_vm6, %v1377_v2 }
 0x699   : > { %2568 = vmatprep.mubr.msk.bf16.mxu0 %vm2779_vm4, %v2778_v20 }
 0x75f   : > { %v3087_v3 = vpop.f32.mrb[12].mxu1 }
 0x760   : > { %v2540_v4 = vpop.f32.mrb[13].mxu1 }
 0x761   : > { %v1275_v5 = vpop.f32.mrb[14].mxu1 }
 0x762   : > { %v2541_v6 = vpop.f32.mrb[15].mxu1 }
 0x763   : > { %v3089_v7 = vpop.f32.mrb[16].mxu0 }
 0x764   : > { %v2672_v8 = vpack.i.bf16 %v3089_v7, %v3087_v3  ;;  %v2546_v9 = vpop.f32.mrb[17].mxu0 }
 0x765   : > { %v1323_v10 = vpop.f32.mrb[18].mxu0 }
 0x766   : > { %v2547_v11 = vpop.f32.mrb[19].mxu0 }
 0x767   : > { %v1370_v12 = vpop.f32.mrb[16].mxu1 }
 0x768   : > { %v1426_v13 = vmul.f32 0.35355338, %v1370_v12  ;;  %v2552_v15 = vpop.f32.mrb[17].mxu1 }
 0x769   : > { %v1373_v16 = vpop.f32.mrb[18].mxu1 }
 0x76a   : > { %v2553_v17 = vpop.f32.mrb[19].mxu1  ;;  %v1428_v19 = vsel %vm885_vm6, %v1426_v13, -inf }
 0x76b   : > { %1429 = vmax.xlane.f32.xlu0 %v1428_v19  ;;  %v1420_v21 = vpop.f32.mrb[20].mxu0 }
 0x76c   : > { %v1427_v24 = vmul.f32 0.35355338, %v1420_v21  ;;  %v2558_v25 = vpop.f32.mrb[21].mxu0 }
 0x76d   : > { %v1423_v26 = vpop.f32.mrb[22].mxu0 }
 0x76e   : > { %v2559_v27 = vpop.f32.mrb[23].mxu0  ;;  %v1431_v28 = vsel %vm885_vm6, %v1427_v24, -inf }
 0x76f   : > { %1432 = vmax.xlane.f32.xlu1 %v1431_v28 }
 0x780   : > { %1452 = vrot.lane.b32.xlu1 %v3005_v30, %s2787_s24 }
 0x784   : > { %1550 = vrot.lane.b32.xlu1 %v3005_v30, %s2788_s2 }
 0x788   : > { %1600 = vrot.lane.b32.xlu1 %v3008_v33, %s2788_s2  ;;  %s3284_s2 = scalar_lea.vmem %s3252_s8, %s2909_s17 }
 0x78c   : > { %1598 = vrot.lane.b32.xlu1 %v3008_v33, %s2789_s26 }
 0x7f8   : > { %v1430_v29 = vpop.xlane.xlu0 %1429 }
 0x7f9   : > { %v1434_v31 = vsub.f32 %v1426_v13, %v1430_v29 }
 0x7fb   : > { %v1436_v32 = vmul.f32 1.442695, %v1434_v31 }
 0x7fc   : > { %v1433_v34 = vpop.xlane.xlu1 %1432 }
 0x7fd   : > { %2713 = vpow2.f32 %v1436_v32  ;;  %v1435_v35 = vsub.f32 %v1427_v24, %v1433_v34 }
 0x7ff   : > { %v1438_v36 = vmul.f32 1.442695, %v1435_v35 }
 0x800   : > { %v1453_v37 = vpop.permute.xlu1 %1452 }
 0x801   : > { %2715 = vpow2.f32 %v1438_v36  ;;  %v1458_v38 = vsel %vm1012_vm7, %v1453_v37, 0 }
 0x802   : > { %2561 = vmatpush3.bf16.msra.mxu1 %v1458_v38 }
 0x803   : > { %2572 = vmatprep.subr.bf16.mxu1 %v2778_v20 }
 0x804   : > { %v1551_v48 = vpop.permute.xlu1 %1550 }
 0x805   : > { %v1556_v52 = vsel %vm885_vm6, %v1551_v48, 0 }
 0x807   : > { %v2714_v39 = vpop.eup %2713 }
 0x808   : > { %v1440_v40 = vsel %vm885_vm6, %v2714_v39, 0.0  ;;  %v1601_v54 = vpop.permute.xlu1 %1600 }
 0x809   : > { %1441 = vadd.xlane.f32.xlu0 %v1440_v40  ;;  %v1606_v56 = vsel %vm885_vm6, %v1601_v54, 0 }
 0x80b   : > { %v2716_v41 = vpop.eup %2715 }
 0x80c   : > { %v1443_v42 = vsel %vm885_vm6, %v2716_v41, 0.0  ;;  %v1599_v58 = vpop.permute.xlu1 %1598 }
 0x80d   : > { %1444 = vadd.xlane.f32.xlu0 %v1443_v42 }
 0x823   : > { %1500 = vrot.lane.b32.xlu0 %v3008_v33, %s2787_s24 }
 0x827   : > { %1548 = vrot.lane.b32.xlu0 %v3005_v30, %s2789_s26 }
 0x896   : > { %v1442_v43 = vpop.xlane.xlu0 %1441 }
 0x897   : > { %2717 = vrcp.f32 %v1442_v43  ;;  %v2689_v43 = vld [vmem:[%s3282_s29] sm:$0xff]  }
 0x89a   : > { %v1445_v44 = vpop.xlane.xlu0 %1444 }
 0x89b   : > { %2719 = vrcp.f32 %v1445_v44  ;;  %v2690_v44 = vld [vmem:[%s3282_s29 + $0x8] sm:$0xff]  }
 0x89e   : > { %v1501_v45 = vpop.permute.xlu0 %1500 }
 0x89f   : > { %v1506_v46 = vsel %vm1012_vm7, %v1501_v45, 0 }
 0x8a0   : > { %2567 = vmatpush3.bf16.msra.mxu0 %v1506_v46 }
 0x8a1   : > { %v2718_v47 = vpop.eup %2717  ;;  %2578 = vmatprep.subr.bf16.mxu0 %v2778_v20 }
 0x8a2   : > { %v1448_v49 = vmul.f32 %v2718_v47, %v2714_v39  ;;  %v1549_v57 = vpop.permute.xlu0 %1548 }
 0x8a4   : > { %v1450_v50 = vpack.c.bf16 %v1448_v49, %v1448_v49 }
 0x8a5   : > { %v2720_v51 = vpop.eup %2719 }
 0x8a6   : > { %v1449_v53 = vmul.f32 %v2720_v51, %v2716_v41  ;;  %2563 = vmatmul.mubr.msk.bf16.vlgmr.msra.gmra.mrb[20].mxu1 %vm885_vm6, %v1450_v50 }
 0x8a7   : > { %2573 = vmatpush3.bf16.xpose.msra.mxu1 %v1556_v52  ;;  %2574 = vmatprep.mubr.msk.bf16.mxu1 %vm2779_vm4, %v2778_v20 }
 0x8a8   : > { %v1451_v55 = vpack.c.bf16 %v1449_v53, %v1449_v53  ;;  %2584 = vmatprep.subr.bf16.mxu1 %v2778_v20 }
 0x8aa   : > { %2569 = vmatmul.mubr.msk.bf16.vlgmr.msra.gmra.mrb[24].mxu0 %vm885_vm6, %v1451_v55 }
 0x8ab   : > { %2579 = vmatpush3.bf16.xpose.msra.mxu0 %v1606_v56  ;;  %2580 = vmatprep.mubr.msk.bf16.mxu0 %vm2779_vm4, %v2778_v20 }
 0x8ac   : > { %2590 = vmatprep.subr.bf16.mxu0 %v2778_v20 }
 0x8ae   : > { %2575 = vmatmul.mubr.msk.bf16.vlgmr.msra.gmra.mrb[24].mxu1 %vm885_vm6, %v1549_v57 }
 0x8af   : > { %2586 = vmatprep.mubr.msk.bf16.mxu1 %vm2779_vm4, %v2778_v20 }
 0x8b2   : > { %2581 = vmatmul.mubr.msk.bf16.vlgmr.msra.gmra.mrb[28].mxu0 %vm885_vm6, %v1599_v58 }
 0x8b3   : > { %2592 = vmatprep.mubr.msk.bf16.mxu0 %vm2779_vm4, %v2778_v20 }
 0x979   : > { %v1494_v59 = vpop.f32.mrb[20].mxu1 }
 0x97a   : > { %v2564_v60 = vpop.f32.mrb[21].mxu1 }
 0x97b   : > { %v1497_v61 = vpop.f32.mrb[22].mxu1 }
 0x97c   : > { %v2565_v62 = vpop.f32.mrb[23].mxu1 }
 0x97d   : > { %v1542_v63 = vpop.f32.mrb[24].mxu0 }
 0x97e   : > { %v2677_v0 = vpack.i.bf16 %v1542_v63, %v1494_v59  ;;  %v2570_v1 = vpop.f32.mrb[25].mxu0 }
 0x97f   : > { %v1545_v2 = vpop.f32.mrb[26].mxu0 }
 0x980   : > { %v2571_v4 = vpop.f32.mrb[27].mxu0 }
 0x981   : > { %v1592_v5 = vpop.f32.mrb[24].mxu1 }
 0x982   : > { %v1648_v6 = vmul.f32 0.35355338, %v1592_v5  ;;  %v2576_v9 = vpop.f32.mrb[25].mxu1 }
 0x983   : > { %v1595_v10 = vpop.f32.mrb[26].mxu1 }
 0x984   : > { %v2577_v11 = vpop.f32.mrb[27].mxu1  ;;  %v1650_v12 = vsel %vm885_vm6, %v1648_v6, -inf }
 0x985   : > { %1651 = vmax.xlane.f32.xlu0 %v1650_v12  ;;  %v1642_v13 = vpop.f32.mrb[28].mxu0 }
 0x986   : > { %v1649_v15 = vmul.f32 0.35355338, %v1642_v13  ;;  %v2582_v16 = vpop.f32.mrb[29].mxu0 }
 0x987   : > { %v1645_v17 = vpop.f32.mrb[30].mxu0 }
 0x988   : > { %v2583_v19 = vpop.f32.mrb[31].mxu0  ;;  %v1653_v21 = vsel %vm885_vm6, %v1649_v15, -inf }
 0x989   : > { %1654 = vmax.xlane.f32.xlu1 %v1653_v21 }
 0x99a   : > { %1674 = vrot.lane.b32.xlu1 %v3005_v30, %s2790_s25 }
 0x99e   : > { %2673 = vrot.lane.b32.xlu1 %v2672_v8, %s2791_s27  ;;  %s3285_s27 = scalar_lea.vmem %s3253_s9, %s2909_s17 }
 0x9a2   : > { %2678 = vrot.lane.b32.xlu1 %v2677_v0, %s2792_s20 }
 0xa12   : > { %v1652_v24 = vpop.xlane.xlu0 %1651 }
 0xa13   : > { %v1656_v25 = vsub.f32 %v1648_v6, %v1652_v24 }
 0xa15   : > { %v1658_v26 = vmul.f32 1.442695, %v1656_v25 }
 0xa16   : > { %v1655_v27 = vpop.xlane.xlu1 %1654 }
 0xa17   : > { %2721 = vpow2.f32 %v1658_v26  ;;  %v1657_v28 = vsub.f32 %v1649_v15, %v1655_v27 }
 0xa19   : > { %v1660_v29 = vmul.f32 1.442695, %v1657_v28 }
 0xa1a   : > { %v1675_v31 = vpop.permute.xlu1 %1674 }
 0xa1b   : > { %2723 = vpow2.f32 %v1660_v29  ;;  %v1680_v32 = vsel %vm1012_vm7, %v1675_v31, 0 }
 0xa1c   : > { %2585 = vmatpush3.bf16.msra.mxu1 %v1680_v32  ;;  %v2691_v32 = vld [vmem:[%s2941_s4] sm:$0xff]  }
 0xa1d   : > { %2596 = vmatprep.subr.bf16.mxu1 %v2778_v20 }
 0xa1e   : > { %v2674_v54 = vpop.permute.xlu1 %2673 }
 0xa1f   : > { %v2676_v56 = vunpack.i.h.bf16 %v2674_v54  ;;  %v2675_v57 = vunpack.i.l.bf16 %v2674_v54 }
 0xa21   : > { %v2722_v30 = vpop.eup %2721  ;;  %v1795_v61 = vsel %vm885_vm6, %v3055_v18, %v2676_v56  ;;  %v1794_v62 = vsel %vm885_vm6, %v3053_v14, %v2675_v57  ;;  %v2405_v18 = vld [vmem:[%s3283_s23] ss:$0 sm:$0xff] }
 0xa22   : > { %v1662_v3 = vsel %vm885_vm6, %v2722_v30, 0.0  ;;  %v2679_v55 = vpop.permute.xlu1 %2678 }
 0xa23   : > { %1663 = vadd.xlane.f32.xlu0 %v1662_v3  ;;  %v2681_v58 = vunpack.i.h.bf16 %v2679_v55  ;;  %v2680_v59 = vunpack.i.l.bf16 %v2679_v55  ;;  %v2693_v3 = vld [vmem:[%s2951_s28] sm:$0xff]  }
 0xa25   : > { %v2724_v7 = vpop.eup %2723  ;;  %v1797_v1 = vsel %vm1796_vm8, %v1794_v62, %v2680_v59  ;;  %v1798_v2 = vsel %vm1796_vm8, %v1795_v61, %v2681_v58 }
 0xa26   : > { %v1665_v8 = vsel %vm885_vm6, %v2724_v7, 0.0 }
 0xa27   : > { %1666 = vadd.xlane.f32.xlu0 %v1665_v8 }
 0xa3d   : > { %1722 = vrot.lane.b32.xlu0 %v3008_v33, %s2790_s25 }
 0xab0   : > { %v1664_v34 = vpop.xlane.xlu0 %1663 }
 0xab1   : > { %2725 = vrcp.f32 %v1664_v34 }
 0xab4   : > { %v1667_v35 = vpop.xlane.xlu0 %1666 }
 0xab5   : > { %2727 = vrcp.f32 %v1667_v35 }
 0xab8   : > { %v1723_v36 = vpop.permute.xlu0 %1722 }
 0xab9   : > { %v1728_v37 = vsel %vm1012_vm7, %v1723_v36, 0 }
 0xaba   : > { %2591 = vmatpush3.bf16.msra.mxu0 %v1728_v37 }
 0xabb   : > { %v2726_v38 = vpop.eup %2725  ;;  %2604 = vmatprep.subr.bf16.mxu0 %v2778_v20 }
 0xabc   : > { %v1670_v39 = vmul.f32 %v2726_v38, %v2722_v30  ;;  %v2692_v30 = vld [vmem:[%s2941_s4 + $0x8] sm:$0xff]  }
 0xabe   : > { %v1672_v40 = vpack.c.bf16 %v1670_v39, %v1670_v39 }
 0xabf   : > { %v2728_v41 = vpop.eup %2727 }
 0xac0   : > { %v1671_v42 = vmul.f32 %v2728_v41, %v2724_v7  ;;  %2587 = vmatmul.mubr.msk.bf16.vlgmr.msra.gmra.mrb[28].mxu1 %vm885_vm6, %v1672_v40  ;;  %v2694_v7 = vld [vmem:[%s2951_s28 + $0x8] sm:$0xff]   ;;  %v2409_v40 = vld [vmem:[%s3284_s2] ss:$0 sm:$0xff] }
 0xac1   : > { %2600 = vmatprep.mubr.msk.bf16.mxu1 %vm2779_vm4, %v2778_v20  ;;  %2597 = vmatpush3.bf16.msra.mxu1 %v2689_v43 }
 0xac2   : > { %v1673_v33 = vpack.c.bf16 %v1671_v42, %v1671_v42  ;;  %2598 = vmatprep.subr.bf16.mxu1 %v2778_v20 }
 0xac4   : > { %2593 = vmatmul.mubr.msk.bf16.vlgmr.msra.gmra.mrb[32].mxu0 %vm885_vm6, %v1673_v33 }
 0xac5   : > { %2608 = vmatprep.mubr.msk.bf16.mxu0 %vm2779_vm4, %v2778_v20  ;;  %2599 = vmatpush3.bf16.msra.mxu1 %v2690_v44  ;;  %v2410_v44 = vld [vmem:[%s3285_s27] ss:$0 sm:$0xff] }
 0xac6   : > { %2612 = vmatprep.subr.bf16.mxu1 %v2778_v20  ;;  %2605 = vmatpush3.bf16.msra.mxu0 %v2691_v32  ;;  %v2422_v32 = vld [vmem:[%s735_s16] ss:$0 sm:$0xff] }
 0xac7   : > { %2606 = vmatprep.subr.bf16.mxu0 %v2778_v20 }
 0xaca   : > { %2607 = vmatpush3.bf16.msra.mxu0 %v2692_v30 }
 0xb93   : > { %v1716_v45 = vpop.f32.mrb[28].mxu1 }
 0xb94   : > { %v2588_v46 = vpop.f32.mrb[29].mxu1 }
 0xb95   : > { %v1719_v47 = vpop.f32.mrb[30].mxu1 }
 0xb96   : > { %v2589_v48 = vpop.f32.mrb[31].mxu1 }
 0xb97   : > { %v1764_v49 = vpop.f32.mrb[32].mxu0 }
 0xb98   : > { %v2682_v50 = vpack.i.bf16 %v1764_v49, %v1716_v45  ;;  %v2594_v51 = vpop.f32.mrb[33].mxu0  ;;  %v2695_v49 = vld [vmem:[%s2951_s28 + $0x10] sm:$0xff]  }
 0xb99   : > { %v1767_v52 = vpop.f32.mrb[34].mxu0  ;;  %v2411_v51 = vld [vmem:[%s721_s6] ss:$0 sm:$0xff] }
 0xb9a   : > { %2683 = vrot.lane.b32.xlu0 %v2682_v50, %s2793_s1  ;;  %v2595_v53 = vpop.f32.mrb[35].mxu0  ;;  %v2696_v50 = vld [vmem:[%s2951_s28 + $0x18] sm:$0xff]  }
 0xc0c   : > { %v2684_v60 = vpop.permute.xlu0 %2683 }
 0xc0d   : > { %v2686_v63 = vunpack.i.h.bf16 %v2684_v60  ;;  %v2685_v0 = vunpack.i.l.bf16 %v2684_v60 }
 0xc0f   : > { %v1801_v4 = vsel %vm1799_vm9, %v1798_v2, %v2686_v63  ;;  %v1800_v5 = vsel %vm1799_vm9, %v1797_v1, %v2685_v0 }
 0xc10   : > { %v1802_v6 = vpack.c.bf16 %v1801_v4, %v1800_v5 }
 0xc12   : > { %2601 = vmatmul.mubr.msk.bf16.vlgmr.msra.gmra.mrb[32].mxu1 %vm835_vm5, %v1802_v6 }
 0xc13   : > { %2620 = vmatprep.mubr.msk.bf16.mxu1 %vm2779_vm4, %v2778_v20  ;;  %2613 = vmatpush3.bf16.msra.mxu1 %v2693_v3 }
 0xc14   : > { %2614 = vmatprep.subr.bf16.mxu1 %v2778_v20 }
 0xc17   : > { %2615 = vmatpush3.bf16.msra.mxu1 %v2694_v7 }
 0xc18   : > { %2616 = vmatprep.subr.bf16.mxu1 %v2778_v20 }
 0xc1b   : > { %2617 = vmatpush3.bf16.msra.mxu1 %v2695_v49 }
 0xc1c   : > { %2618 = vmatprep.subr.bf16.mxu1 %v2778_v20  ;;  %v2415_v20 = vld [vmem:[%s729_s19] ss:$0 sm:$0xff] }
 0xc1f   : > { %2619 = vmatpush3.bf16.msra.mxu1 %v2696_v50 }
 0xce5   : > { %v1863_v9 = vpop.f32.mrb[32].mxu1 }
 0xce6   : > { %v1864_v10 = vadd.f32 %v2405_v18, %v1863_v9  ;;  %v2602_v14 = vpop.f32.mrb[33].mxu1 }
 0xce7   : > { %v1866_v11 = vpop.f32.mrb[34].mxu1 }
 0xce8   : > { %v1867_v12 = vadd.f32 %v2405_v18, %v1866_v11  ;;  %v2603_v13 = vpop.f32.mrb[35].mxu1  ;;  %v1870_v15 = vadd.f32 %v1864_v10, %v2987_v22 }
 0xcea   : > { %v1872_v16 = vsel %vm835_vm5, %v1870_v15, 0.0  ;;  %v1871_v17 = vadd.f32 %v1867_v12, %v2989_v23 }
 0xceb   : > { %1873 = vadd.xlane.f32.xlu1 %v1872_v16 }
 0xcec   : > { %v1875_v19 = vsel %vm835_vm5, %v1871_v17, 0.0 }
 0xced   : > { %1876 = vadd.xlane.f32.xlu0 %v1875_v19 }
 0xd78   : > { %v1874_v21 = vpop.xlane.xlu1 %1873 }
 0xd79   : > { %v1879_v24 = vmul.f32 0.03125, %v1874_v21 }
 0xd7a   : > { %v1877_v25 = vpop.xlane.xlu0 %1876 }
 0xd7b   : > { %v1881_v26 = vsub.f32 %v1870_v15, %v1879_v24  ;;  %v1880_v27 = vmul.f32 0.03125, %v1877_v25 }
 0xd7d   : > { %v1882_v28 = vsub.f32 %v1871_v17, %v1880_v27  ;;  %v1883_v29 = vmul.f32 %v1881_v26, %v1881_v26 }
 0xd7f   : > { %v1885_v22 = vsel %vm835_vm5, %v1883_v29, 0.0  ;;  %v1884_v31 = vmul.f32 %v1882_v28, %v1882_v28 }
 0xd80   : > { %1886 = vadd.xlane.f32.xlu0 %v1885_v22  ;;  %v2421_v22 = vld [vmem:[%s732_s21] ss:$0 sm:$0xff]  ;;  %s3286_s21 = sld [smem:[#allocation14_spill]] (!%p2423_p5) }
 0xd81   : > { %v1888_v23 = vsel %vm835_vm5, %v1884_v31, 0.0 }
 0xd82   : > { %1889 = vadd.xlane.f32.xlu1 %v1888_v23 }
 0xe0d   : > { %v1887_v8 = vpop.xlane.xlu0 %1886 }
 0xe0e   : > { %v1891_v34 = vmul.f32 0.03125, %v1887_v8 }
 0xe0f   : > { %v1890_v35 = vpop.xlane.xlu1 %1889 }
 0xe10   : > { %v1893_v36 = vadd.f32 1e-05, %v1891_v34  ;;  %v1892_v37 = vmul.f32 0.03125, %v1890_v35 }
 0xe12   : > { %2729 = vrsqrt.f32 %v1893_v36  ;;  %v1894_v38 = vadd.f32 1e-05, %v1892_v37  ;;  %v2794_v36 = vmov (!%p2423_p5), 0.0|0.0   ;;  %v2796_v37 = vmov (!%p2423_p5), 0.0  }
 0xe13   : > { %2631 = vmatprep.subr.bf16.mxu0 (!%p2423_p5), %v2794_v36 }
 0xe14   : > { %2731 = vrsqrt.f32 %v1894_v38  ;;  %v2125_v38 = vld [vmem:[#allocation3] sm:$0x1] (!%p2423_p5) }
 0xe1c   : > { %v2730_v39 = vpop.eup %2729 }
 0xe1d   : > { %v1897_v41 = vmul.f32 %v2730_v39, %v1881_v26  ;;  %v2797_v39 = vmov (!%p2423_p5), 0  }
 0xe1e   : > { %v2732_v42 = vpop.eup %2731  ;;  %2737 = vset.pattern.permute.xlu0 (!%p2423_p5), %v2797_v39 }
 0xe1f   : > { %v1906_v33 = vmul.f32 %v2409_v40, %v1897_v41  ;;  %v1898_v43 = vmul.f32 %v2732_v42, %v1882_v28  ;;  %v2131_v41 = vlaneseq (!%p2423_p5) }
 0xe21   : > { %v1907_v45 = vmul.f32 %v2409_v40, %v1898_v43  ;;  %v1915_v46 = vadd.f32 %v2410_v44, %v1906_v33  ;;  %v2124_v40 = vld [vmem:[%s3286_s21] sm:$0x1] (!%p2423_p5)  ;;  %v2132_v42 = vshrl.u32 (!%p2423_p5), %v2131_v41, 7 }
 0xe23   : > { %v1916_v47 = vadd.f32 %v2410_v44, %v1907_v45  ;;  %v2133_v33 = vsub.s32 (!%p2423_p5), 0, %v2132_v42 }
 0xe25   : > { %v1917_v48 = vpack.c.bf16 %v1916_v47, %v1915_v46 }
 0xe27   : > { %2609 = vmatmul.mubr.msk.bf16.vlgmr.msra.gmra.mrb[36].mxu0 %vm835_vm5, %v1917_v48 }
 0xe28   : > { %2628 = vmatprep.mubr.msk.f32.mxu0 (!%p2423_p5), %vm2795_vm12, %v2796_v37 }
 0xefa   : > { %v1978_v52 = vpop.f32.mrb[36].mxu0 }
 0xefb   : > { %v1979_v53 = vadd.f32 %v2411_v51, %v1978_v52  ;;  %v2610_v54 = vpop.f32.mrb[37].mxu0 }
 0xefc   : > { %v1981_v55 = vpop.f32.mrb[38].mxu0 }
 0xefd   : > { %v1982_v56 = vadd.f32 %v2411_v51, %v1981_v55  ;;  %v2611_v57 = vpop.f32.mrb[39].mxu0  ;;  %v1985_v58 = vmax.f32 %v1979_v53, 0.0 }
 0xeff   : > { %v1986_v59 = vmax.f32 %v1982_v56, 0.0 }
 0xf01   : > { %v1987_v60 = vpack.c.bf16 %v1986_v59, %v1985_v58 }
 0xf03   : > { %2621 = vmatmul.mubr.msk.bf16.vlgmr.msra.gmra.mrb[36].mxu1 %vm2027_vm10, %v1987_v60 }
 0xfd6   : > { %v2065_v61 = vpop.f32.mrb[36].mxu1 }
 0xfd7   : > { %v2066_v62 = vadd.f32 %v2415_v20, %v2065_v61  ;;  %v2622_v63 = vpop.f32.mrb[37].mxu1 }
 0xfd8   : > { %v2068_v0 = vpop.f32.mrb[38].mxu1 }
 0xfd9   : > { %v2069_v1 = vadd.f32 %v2415_v20, %v2068_v0  ;;  %v2623_v2 = vpop.f32.mrb[39].mxu1  ;;  %v2072_v4 = vadd.f32 %v2066_v62, %v1915_v46 }
 0xfdb   : > { %v2074_v5 = vsel %vm835_vm5, %v2072_v4, 0.0  ;;  %v2073_v6 = vadd.f32 %v2069_v1, %v1916_v47 }
 0xfdc   : > { %2075 = vadd.xlane.f32.xlu0 %v2074_v5 }
 0xfdd   : > { %v2077_v18 = vsel %vm835_vm5, %v2073_v6, 0.0 }
 0xfde   : > { %2078 = vadd.xlane.f32.xlu1 %v2077_v18 }
0x1069   : > { %v2076_v9 = vpop.xlane.xlu0 %2075 }
0x106a   : > { %v2080_v10 = vmul.f32 0.03125, %v2076_v9 }
0x106b   : > { %v2079_v14 = vpop.xlane.xlu1 %2078 }
0x106c   : > { %v2082_v11 = vsub.f32 %v2072_v4, %v2080_v10  ;;  %v2081_v12 = vmul.f32 0.03125, %v2079_v14 }
0x106e   : > { %v2083_v13 = vsub.f32 %v2073_v6, %v2081_v12  ;;  %v2084_v15 = vmul.f32 %v2082_v11, %v2082_v11 }
0x1070   : > { %v2086_v16 = vsel %vm835_vm5, %v2084_v15, 0.0  ;;  %v2085_v17 = vmul.f32 %v2083_v13, %v2083_v13 }
0x1071   : > { %2087 = vadd.xlane.f32.xlu0 %v2086_v16 }
0x1072   : > { %v2089_v19 = vsel %vm835_vm5, %v2085_v17, 0.0 }
0x1073   : > { %2090 = vadd.xlane.f32.xlu1 %v2089_v19 }
0x1087   : > { %2128 = vperm.xlu0 (!%p2423_p5), %2737, %v2125_v38  }
0x10fe   : > { %v2088_v21 = vpop.xlane.xlu0 %2087 }
0x10ff   : > { %v2092_v24 = vmul.f32 0.03125, %v2088_v21 }
0x1100   : > { %v2091_v25 = vpop.xlane.xlu1 %2090 }
0x1101   : > { %v2094_v26 = vadd.f32 1e-05, %v2092_v24  ;;  %v2093_v27 = vmul.f32 0.03125, %v2091_v25 }
0x1103   : > { %2733 = vrsqrt.f32 %v2094_v26  ;;  %v2095_v28 = vadd.f32 1e-05, %v2093_v27 }
0x1105   : > { %2735 = vrsqrt.f32 %v2095_v28 }
0x1106   : > { %v2129_v43 = vpop.permute.xlu0 (!%p2423_p5), %2128 }
0x1107   : > { %v2134_v44 = vrot.slane (!%p2423_p5), %v2129_v43, %v2133_v33 }
0x110d   : > { %v2734_v29 = vpop.eup %2733 }
0x110e   : > { %v2098_v31 = vmul.f32 %v2734_v29, %v2082_v11 }
0x110f   : > { %v2736_v23 = vpop.eup %2735 }
0x1110   : > { %v2107_v30 = vmul.f32 %v2421_v22, %v2098_v31  ;;  %v2099_v3 = vmul.f32 %v2736_v23, %v2083_v13  ;;  %2123 = sbr.rel (%p2423_p5) target bundleno = 4598 (0x11f6), region = 100 }
0x1112   : > { %v2116_v7 = vadd.f32 %v2422_v32, %v2107_v30  ;;  %v2108_v8 = vmul.f32 %v2421_v22, %v2099_v3 }
0x1114   : > { %2118 = vst.msk [vmem:[#allocation2] sm:$0xff] %vm835_vm5, %v2116_v7  ;;  %v2117_v34 = vadd.f32 %v2422_v32, %v2108_v8 }
0x1116   : > { %2119 = vst.msk [vmem:[#allocation2 + $0x8] sm:$0xff] %vm835_vm5, %v2117_v34  ;;  %v2632_v35 = vpack.c.bf16 (!%p2423_p5), %v2117_v34, %v2116_v7 }
0x1118   : > { %2634 = vmatpush3.bf16.xpose.msk.msra.mxu0 %vm2633_vm11, %v2632_v35 }
0x111f   : > { %2629 = vmatmul.mubr.msk.f32.vlgmr.msra.gmra.mrb[0].mxu0 %vm835_vm5, %v2124_v40 }
0x11f2   : > { %v2210_v45 = vpop.f32.mrb[0].mxu0 }
0x11f3   : > { %v2211_v46 = vadd.f32 %v2210_v45, %v2134_v44  ;;  %v2630_v47 = vpop.f32.mrb[1].mxu0 }
0x11f5   : > { %2215 = vst.msk [vmem:[#allocation4] sm:$0x1] %vm2214_vm13, %v2211_v46 }
0x11f6 PF: > { %p2639_p6 = scmp.eq.s32.totalorder %s2903_s30, 1  ;;  %s2798_s23 = smov [#allocation4]  }
0x11f7   : > { %s2223_s4 = sshll.u32 %s2798_s23, 4  ;;  %s2224_s4 = int_to_ptr.vmem [resolvable:$true] %s2223_s4 }
0x11f8   : > { %s2738_s24 = scalar_lea.vmem %s2224_s4, 16  ;;  %s2744_s2 = scalar_lea.vmem %s2224_s4, 32 }
0x11f9   : > { %p2739_p7 = scmp.ne.s32.totalorder %s2224_s4, %s2738_s24  ;;  %p2745_p10 = scmp.lt.s32.totalorder %s2224_s4, %s2224_s4 }
0x11fa   : > { %p2746_p11 = scmp.lt.s32.totalorder %s2744_s2, %s2738_s24 }
0x11fb   : > { %p2740_p8 = pnand %p2739_p7, %p2639_p6 }
0x11fc   : > { %p2747_p12 = por %p2746_p11, %p2745_p10 }
0x11fd   : > { %p2741_p9 = pneg %p2740_p8 }
0x11ff   : > { %p2748_p13 = pnand %p2747_p12, %p2741_p9 }
0x1201   : > { %2751 = shalt.err (!%p2748_p13)
}
0x1202   : > { %s3287_s27 = sld [smem:[#allocation15_spill]] }
0x1208   : > { %s2752_s20 = scalar_lea.hbm %s3287_s27, 16 }
0x1209   : > { %p2753_p0 = scmp.ne.s32.totalorder %s3287_s27, %s2752_s20  ;;  %p2758_p3 = scmp.lt.u32.totalorder %s2752_s20, %s3287_s27 }
0x120b   : > { %p2754_p1 = pnand %p2753_p0, %p2639_p6 }
0x120d   : > { %p2755_p2 = pneg %p2754_p1 }
0x120f   : > { %p2760_p4 = pnand %p2758_p3, %p2755_p2 }
0x1211   : > { %2763 = shalt.err (!%p2760_p4)
}
0x1212   : > { %2636 = dma.vmem_to_hbm [thread:$0]  (%p2639_p6), %s2224_s4, 16, %s3287_s27, [#allocation5]  }
0x1213   : > { %2769 = dma.done.wait (%p2639_p6), [#allocation5], 16  }
0x1214   : > { %2771 = vsyncadd (%p2639_p6), [#allocation5], 4294967280 }
0x1215 PF: > { %s3288_s22 = sld [smem:[#allocation7_spill]] }
0x121b   : > { %s31_s29 = sadd.s32 1, %s3288_s22  }
0x121c   : > { %p28_p5 = scmp.ge.s32.totalorder %s31_s29, 4  }
0x121e   :  { %30 = sbr.rel (!%p28_p5) target bundleno = 9 (0x9), region = 160 }
0x1225   :  { %2236 = vsyncpa [#allocation5], 1 }
0x1226   :  { %2238 = vsyncpa [#allocation5 + $0x1], 1 }

</bundles_post_ra>
